<compile_context>
chip_gen: v7x
topology: tpu7x:2x2x1
jax: 0.10.0
libtpu: 0.0.40
codegen_flags: <defaults>
</compile_context>

<pallas_src>
import functools

import jax
import jax.numpy as jnp
from jax.experimental import pallas as pl
from jax.experimental.pallas import tpu as pltpu


# -----------------------------------------------------------------------------
# In-kernel helpers (operate on jnp values already loaded from VMEM refs)
# -----------------------------------------------------------------------------
def _mm(a, b):
    """MXU matmul: bf16 operands, f32 accumulation."""
    return jnp.dot(a.astype(jnp.bfloat16), b.astype(jnp.bfloat16),
                   preferred_element_type=jnp.float32)


def _attention(q, k, v, *, num_heads, head_dim, scale):
    """Dense multi-head attention for one batch element.

    q:(T,E) k,v:(S,E) f32 -> (T,E) f32.  Heads are contiguous blocks of the
    embedding dim (matches torch view(B,N,H,Dh)); per-target softmax over all
    S keys reproduces torch_geometric softmax(attn_score, index).
    """
    outs = []
    for h in range(num_heads):
        lo, hi = h * head_dim, (h + 1) * head_dim
        q_h = q[:, lo:hi]                    # (T, Dh)
        k_h = k[:, lo:hi]                    # (S, Dh)
        v_h = v[:, lo:hi]                    # (S, Dh)
        # scores: contract head_dim (last dim of both) -> (T, S)
        s = jax.lax.dot_general(
            q_h.astype(jnp.bfloat16), k_h.astype(jnp.bfloat16),
            (((1,), (1,)), ((), ())),
            preferred_element_type=jnp.float32,
        ) * scale
        m = jnp.max(s, axis=-1, keepdims=True)
        p = jnp.exp(s - m)
        l = jnp.sum(p, axis=-1, keepdims=True)
        w = p * pl.reciprocal(l, approx=True)       # EUP reciprocal
        outs.append(_mm(w, v_h))                    # (T, Dh)
    # lane-dense (T, E) slab
    return jnp.concatenate(outs, axis=-1)


def _add_layernorm(x, y, gamma, beta, eps):
    """LayerNorm(x + y) over the last dim, f32 math.  gamma/beta:(1,E)."""
    z = x + y
    mu = jnp.mean(z, axis=-1, keepdims=True)
    var = jnp.mean((z - mu) * (z - mu), axis=-1, keepdims=True)
    return (z - mu) * jax.lax.rsqrt(var + eps) * gamma + beta


# -----------------------------------------------------------------------------
# Fused decoder-layer kernel: one batch element per grid step
# -----------------------------------------------------------------------------
def _decoder_layer_kernel(
        tgt_ref, mem_ref,
        wqkv_s_ref, bqkv_s_ref, wo_s_ref, bo_s_ref,          # self-attention
        wq_c_ref, bq_c_ref, wkv_c_ref, bkv_c_ref,            # cross-attention
        wo_c_ref, bo_c_ref,
        w1_ref, b1_ref, w2_ref, b2_ref,                      # FFN
        lng_ref, lnb_ref,                                    # LayerNorm (3,E)
        out_ref,
        *, num_heads, eps):
    x = tgt_ref[0].astype(jnp.float32)        # (T, E)
    mem = mem_ref[0].astype(jnp.float32)      # (S, E)
    E = x.shape[-1]
    H = num_heads
    Dh = E // H
    scale = Dh ** (-0.5)

    g_all = lng_ref[...]                      # (3, E)
    b_all = lnb_ref[...]                      # (3, E)

    # ---------------- self-attention + residual + norm1 ----------------
    qkv = _mm(x, wqkv_s_ref[...]) + bqkv_s_ref[...]           # (T, 3E)
    q_s = qkv[:, 0 * E:1 * E]
    k_s = qkv[:, 1 * E:2 * E]
    v_s = qkv[:, 2 * E:3 * E]
    attn_s = _attention(q_s, k_s, v_s, num_heads=H, head_dim=Dh, scale=scale)
    sa = _mm(attn_s, wo_s_ref[...]) + bo_s_ref[...]           # (T, E)
    t1 = _add_layernorm(x, sa, g_all[0:1, :], b_all[0:1, :], eps)

    # ---------------- cross-attention + residual + norm2 ----------------
    q_c = _mm(t1, wq_c_ref[...]) + bq_c_ref[...]              # (T, E)
    kv_c = _mm(mem, wkv_c_ref[...]) + bkv_c_ref[...]          # (S, 2E)
    k_c = kv_c[:, 0 * E:1 * E]
    v_c = kv_c[:, 1 * E:2 * E]
    attn_c = _attention(q_c, k_c, v_c, num_heads=H, head_dim=Dh, scale=scale)
    ca = _mm(attn_c, wo_c_ref[...]) + bo_c_ref[...]           # (T, E)
    t2 = _add_layernorm(t1, ca, g_all[1:2, :], b_all[1:2, :], eps)

    # ---------------- FFN + residual + norm3 ----------------
    hmid = jnp.maximum(_mm(t2, w1_ref[...]) + b1_ref[...], 0.0)   # (T, F)
    f = _mm(hmid, w2_ref[...]) + b2_ref[...]                      # (T, E)
    t3 = _add_layernorm(t2, f, g_all[2:3, :], b_all[2:3, :], eps)

    out_ref[0] = t3.astype(out_ref.dtype)


# -----------------------------------------------------------------------------
# Wrapper
# -----------------------------------------------------------------------------
def transformer_decoder_layer(tgt, memory, params, *, num_heads, eps=1e-5):
    """tgt:(B,T,E) memory:(B,S,E) -> (B,T,E).  Unmasked (default) path."""
    # TODO(synk): optional boolean attn / key-padding masks (None in the
    # reference default path) would add a -inf additive bias input here.
    B, T, E = tgt.shape
    S = memory.shape[1]

    weights = [
        params["wqkv_s"], params["bqkv_s"], params["wo_s"], params["bo_s"],
        params["wq_c"], params["bq_c"], params["wkv_c"], params["bkv_c"],
        params["wo_c"], params["bo_c"],
        params["w1"], params["b1"], params["w2"], params["b2"],
        params["ln_g"], params["ln_b"],
    ]

    in_specs = [
        pl.BlockSpec((1, T, E), lambda b: (b, 0, 0)),   # tgt
        pl.BlockSpec((1, S, E), lambda b: (b, 0, 0)),   # memory
    ] + [
        # each weight is tiny: resident in full in VMEM for every grid step
        pl.BlockSpec(w.shape, lambda b: (0, 0)) for w in weights
    ]

    return pl.pallas_call(
        functools.partial(_decoder_layer_kernel, num_heads=num_heads, eps=eps),
        out_shape=jax.ShapeDtypeStruct((B, T, E), jnp.float32),
        grid=(B,),
        in_specs=in_specs,
        out_specs=pl.BlockSpec((1, T, E), lambda b: (b, 0, 0)),
        compiler_params=pltpu.CompilerParams(
            dimension_semantics=("parallel",),   # v7x: shard batch over 2 TCs
        ),
    )(tgt, memory, *weights)


# -----------------------------------------------------------------------------
# Deterministic parameter construction (QKV / KV packed along output dim)
# -----------------------------------------------------------------------------
def make_params(key, E, F):
    ks = jax.random.split(key, 14)
    mk = lambda k, shp: 0.1 * jax.random.normal(k, shp, jnp.float32)
    return {
        # self-attention: packed (Wq | Wk | Wv)
        "wqkv_s": mk(ks[0], (E, 3 * E)), "bqkv_s": mk(ks[1], (1, 3 * E)),
        "wo_s": mk(ks[2], (E, E)), "bo_s": mk(ks[3], (1, E)),
        # cross-attention: Q from target, packed (Wk | Wv) from memory
        "wq_c": mk(ks[4], (E, E)), "bq_c": mk(ks[5], (1, E)),
        "wkv_c": mk(ks[6], (E, 2 * E)), "bkv_c": mk(ks[7], (1, 2 * E)),
        "wo_c": mk(ks[8], (E, E)), "bo_c": mk(ks[9], (1, E)),
        # FFN
        "w1": mk(ks[10], (E, F)), "b1": mk(ks[11], (1, F)),
        "w2": mk(ks[12], (F, E)), "b2": mk(ks[13], (1, E)),
        # LayerNorm 1/2/3 stacked as rows
        "ln_g": jnp.ones((3, E), jnp.float32),
        "ln_b": jnp.zeros((3, E), jnp.float32),
    }


# -----------------------------------------------------------------------------
# Main
# -----------------------------------------------------------------------------
if __name__ == "__main__":
    B, T, S, E, H, F = 2, 8, 12, 32, 4, 64

    key = jax.random.PRNGKey(0)
    k_tgt, k_mem, k_par = jax.random.split(key, 3)
    tgt = jax.random.normal(k_tgt, (B, T, E), jnp.float32)
    memory = jax.random.normal(k_mem, (B, S, E), jnp.float32)
    params = make_params(k_par, E, F)

    fn = jax.jit(functools.partial(transformer_decoder_layer, num_heads=H))
    out = fn(tgt, memory, params)
    jax.block_until_ready(out)

    assert out.shape == (B, T, E) and out.dtype == jnp.float32
    assert bool(jnp.all(jnp.isfinite(out)))
    print("KERNEL_OK")
</pallas_src>

<mosaic_0001>
module attributes {stable_mosaic.version = 11 : i64} {
  func.func @_decoder_layer_kernel(%arg0: i32, %arg1: memref<1x8x32xf32, #tpu.memory_space<vmem>>, %arg2: memref<1x12x32xf32, #tpu.memory_space<vmem>>, %arg3: memref<32x96xf32, #tpu.memory_space<vmem>>, %arg4: memref<1x96xf32, #tpu.memory_space<vmem>>, %arg5: memref<32x32xf32, #tpu.memory_space<vmem>>, %arg6: memref<1x32xf32, #tpu.memory_space<vmem>>, %arg7: memref<32x32xf32, #tpu.memory_space<vmem>>, %arg8: memref<1x32xf32, #tpu.memory_space<vmem>>, %arg9: memref<32x64xf32, #tpu.memory_space<vmem>>, %arg10: memref<1x64xf32, #tpu.memory_space<vmem>>, %arg11: memref<32x32xf32, #tpu.memory_space<vmem>>, %arg12: memref<1x32xf32, #tpu.memory_space<vmem>>, %arg13: memref<32x64xf32, #tpu.memory_space<vmem>>, %arg14: memref<1x64xf32, #tpu.memory_space<vmem>>, %arg15: memref<64x32xf32, #tpu.memory_space<vmem>>, %arg16: memref<1x32xf32, #tpu.memory_space<vmem>>, %arg17: memref<3x32xf32, #tpu.memory_space<vmem>>, %arg18: memref<3x32xf32, #tpu.memory_space<vmem>>, %arg19: memref<1x8x32xf32, #tpu.memory_space<vmem>>) attributes {dimension_semantics = [#tpu.dimension_semantics<parallel>], iteration_bounds = array<i64: 2>, scalar_prefetch = 0 : i64, scratch_operands = 0 : i64, tpu.core_type = #tpu.core_type<tc>, window_params = [{transform_indices = @transform_0, window_bounds = array<i64: 1, 8, 32>}, {transform_indices = @transform_1, window_bounds = array<i64: 1, 12, 32>}, {pipeline_mode = #tpu.pipeline_mode<synchronous>, transform_indices = @transform_2, window_bounds = array<i64: 32, 96>}, {pipeline_mode = #tpu.pipeline_mode<synchronous>, transform_indices = @transform_3, window_bounds = array<i64: 1, 96>}, {pipeline_mode = #tpu.pipeline_mode<synchronous>, transform_indices = @transform_4, window_bounds = array<i64: 32, 32>}, {pipeline_mode = #tpu.pipeline_mode<synchronous>, transform_indices = @transform_5, window_bounds = array<i64: 1, 32>}, {pipeline_mode = #tpu.pipeline_mode<synchronous>, transform_indices = @transform_6, window_bounds = array<i64: 32, 32>}, {pipeline_mode = #tpu.pipeline_mode<synchronous>, transform_indices = @transform_7, window_bounds = array<i64: 1, 32>}, {pipeline_mode = #tpu.pipeline_mode<synchronous>, transform_indices = @transform_8, window_bounds = array<i64: 32, 64>}, {pipeline_mode = #tpu.pipeline_mode<synchronous>, transform_indices = @transform_9, window_bounds = array<i64: 1, 64>}, {pipeline_mode = #tpu.pipeline_mode<synchronous>, transform_indices = @transform_10, window_bounds = array<i64: 32, 32>}, {pipeline_mode = #tpu.pipeline_mode<synchronous>, transform_indices = @transform_11, window_bounds = array<i64: 1, 32>}, {pipeline_mode = #tpu.pipeline_mode<synchronous>, transform_indices = @transform_12, window_bounds = array<i64: 32, 64>}, {pipeline_mode = #tpu.pipeline_mode<synchronous>, transform_indices = @transform_13, window_bounds = array<i64: 1, 64>}, {pipeline_mode = #tpu.pipeline_mode<synchronous>, transform_indices = @transform_14, window_bounds = array<i64: 64, 32>}, {pipeline_mode = #tpu.pipeline_mode<synchronous>, transform_indices = @transform_15, window_bounds = array<i64: 1, 32>}, {pipeline_mode = #tpu.pipeline_mode<synchronous>, transform_indices = @transform_16, window_bounds = array<i64: 3, 32>}, {pipeline_mode = #tpu.pipeline_mode<synchronous>, transform_indices = @transform_17, window_bounds = array<i64: 3, 32>}, {transform_indices = @transform_18, window_bounds = array<i64: 1, 8, 32>}]} {
    %c0 = arith.constant 0 : index
    %c0_0 = arith.constant 0 : index
    %c0_1 = arith.constant 0 : index
    %0 = vector.load %arg1[%c0, %c0_0, %c0_1] : memref<1x8x32xf32, #tpu.memory_space<vmem>>, vector<1x8x32xf32>
    %1 = vector.shape_cast %0 : vector<1x8x32xf32> to vector<8x32xf32>
    %c0_2 = arith.constant 0 : index
    %c0_3 = arith.constant 0 : index
    %c0_4 = arith.constant 0 : index
    %2 = vector.load %arg2[%c0_2, %c0_3, %c0_4] : memref<1x12x32xf32, #tpu.memory_space<vmem>>, vector<1x12x32xf32>
    %3 = vector.shape_cast %2 : vector<1x12x32xf32> to vector<12x32xf32>
    %c0_5 = arith.constant 0 : index
    %c0_6 = arith.constant 0 : index
    %4 = vector.load %arg17[%c0_5, %c0_6] : memref<3x32xf32, #tpu.memory_space<vmem>>, vector<3x32xf32>
    %c0_7 = arith.constant 0 : index
    %c0_8 = arith.constant 0 : index
    %5 = vector.load %arg18[%c0_7, %c0_8] : memref<3x32xf32, #tpu.memory_space<vmem>>, vector<3x32xf32>
    %c0_9 = arith.constant 0 : index
    %c0_10 = arith.constant 0 : index
    %6 = vector.load %arg3[%c0_9, %c0_10] : memref<32x96xf32, #tpu.memory_space<vmem>>, vector<32x96xf32>
    %7 = arith.truncf %1 : vector<8x32xf32> to vector<8x32xbf16>
    %8 = arith.truncf %6 : vector<32x96xf32> to vector<32x96xbf16>
    %cst = arith.constant dense<0.000000e+00> : vector<8x96xf32>
    %9 = tpu.matmul %7, %8, %cst {dimension_numbers = #tpu.dot_dimension_numbers<[1], [0], [0], [1], [0, 0, 1, 1], [], []>} : vector<8x32xbf16>, vector<32x96xbf16>, vector<8x96xf32> -> vector<8x96xf32>
    %c0_11 = arith.constant 0 : index
    %c0_12 = arith.constant 0 : index
    %10 = vector.load %arg4[%c0_11, %c0_12] : memref<1x96xf32, #tpu.memory_space<vmem>>, vector<1x96xf32>
    %11 = vector.broadcast %10 : vector<1x96xf32> to vector<8x96xf32>
    %12 = arith.addf %9, %11 : vector<8x96xf32>
    %13 = vector.extract_strided_slice %12 {offsets = [0, 0], sizes = [8, 32], strides = [1, 1]} : vector<8x96xf32> to vector<8x32xf32>
    %14 = vector.extract_strided_slice %12 {offsets = [0, 32], sizes = [8, 32], strides = [1, 1]} : vector<8x96xf32> to vector<8x32xf32>
    %15 = vector.extract_strided_slice %12 {offsets = [0, 64], sizes = [8, 32], strides = [1, 1]} : vector<8x96xf32> to vector<8x32xf32>
    %16 = vector.extract_strided_slice %13 {offsets = [0, 0], sizes = [8, 8], strides = [1, 1]} : vector<8x32xf32> to vector<8x8xf32>
    %17 = vector.extract_strided_slice %14 {offsets = [0, 0], sizes = [8, 8], strides = [1, 1]} : vector<8x32xf32> to vector<8x8xf32>
    %18 = vector.extract_strided_slice %15 {offsets = [0, 0], sizes = [8, 8], strides = [1, 1]} : vector<8x32xf32> to vector<8x8xf32>
    %19 = arith.truncf %16 : vector<8x8xf32> to vector<8x8xbf16>
    %20 = arith.truncf %17 : vector<8x8xf32> to vector<8x8xbf16>
    %cst_13 = arith.constant dense<0.000000e+00> : vector<8x8xf32>
    %21 = tpu.matmul %19, %20, %cst_13 {dimension_numbers = #tpu.dot_dimension_numbers<[1], [1], [0], [0], [0, 0, 1, 0], [], []>} : vector<8x8xbf16>, vector<8x8xbf16>, vector<8x8xf32> -> vector<8x8xf32>
    %cst_14 = arith.constant 0.353553385 : f32
    %22 = vector.broadcast %cst_14 : f32 to vector<8x8xf32>
    %23 = arith.mulf %21, %22 : vector<8x8xf32>
    %cst_15 = arith.constant dense<0xFF800000> : vector<8xf32>
    %24 = vector.multi_reduction <maximumf>, %23, %cst_15 [1] : vector<8x8xf32> to vector<8xf32>
    %25 = vector.shape_cast %24 : vector<8xf32> to vector<8x1xf32>
    %26 = vector.broadcast %25 : vector<8x1xf32> to vector<8x8xf32>
    %27 = arith.subf %23, %26 : vector<8x8xf32>
    %28 = math.exp %27 : vector<8x8xf32>
    %cst_16 = arith.constant dense<0.000000e+00> : vector<8xf32>
    %29 = vector.multi_reduction <add>, %28, %cst_16 [1] : vector<8x8xf32> to vector<8xf32>
    %30 = vector.shape_cast %29 : vector<8xf32> to vector<8x1xf32>
    %31 = tpu.reciprocal %30 {approx = true} : vector<8x1xf32> -> vector<8x1xf32>
    %32 = vector.broadcast %31 : vector<8x1xf32> to vector<8x8xf32>
    %33 = arith.mulf %28, %32 : vector<8x8xf32>
    %34 = arith.truncf %33 : vector<8x8xf32> to vector<8x8xbf16>
    %35 = arith.truncf %18 : vector<8x8xf32> to vector<8x8xbf16>
    %cst_17 = arith.constant dense<0.000000e+00> : vector<8x8xf32>
    %36 = tpu.matmul %34, %35, %cst_17 {dimension_numbers = #tpu.dot_dimension_numbers<[1], [0], [0], [1], [0, 0, 1, 1], [], []>} : vector<8x8xbf16>, vector<8x8xbf16>, vector<8x8xf32> -> vector<8x8xf32>
    %37 = vector.extract_strided_slice %13 {offsets = [0, 8], sizes = [8, 8], strides = [1, 1]} : vector<8x32xf32> to vector<8x8xf32>
    %38 = vector.extract_strided_slice %14 {offsets = [0, 8], sizes = [8, 8], strides = [1, 1]} : vector<8x32xf32> to vector<8x8xf32>
    %39 = vector.extract_strided_slice %15 {offsets = [0, 8], sizes = [8, 8], strides = [1, 1]} : vector<8x32xf32> to vector<8x8xf32>
    %40 = arith.truncf %37 : vector<8x8xf32> to vector<8x8xbf16>
    %41 = arith.truncf %38 : vector<8x8xf32> to vector<8x8xbf16>
    %cst_18 = arith.constant dense<0.000000e+00> : vector<8x8xf32>
    %42 = tpu.matmul %40, %41, %cst_18 {dimension_numbers = #tpu.dot_dimension_numbers<[1], [1], [0], [0], [0, 0, 1, 0], [], []>} : vector<8x8xbf16>, vector<8x8xbf16>, vector<8x8xf32> -> vector<8x8xf32>
    %cst_19 = arith.constant 0.353553385 : f32
    %43 = vector.broadcast %cst_19 : f32 to vector<8x8xf32>
    %44 = arith.mulf %42, %43 : vector<8x8xf32>
    %cst_20 = arith.constant dense<0xFF800000> : vector<8xf32>
    %45 = vector.multi_reduction <maximumf>, %44, %cst_20 [1] : vector<8x8xf32> to vector<8xf32>
    %46 = vector.shape_cast %45 : vector<8xf32> to vector<8x1xf32>
    %47 = vector.broadcast %46 : vector<8x1xf32> to vector<8x8xf32>
    %48 = arith.subf %44, %47 : vector<8x8xf32>
    %49 = math.exp %48 : vector<8x8xf32>
    %cst_21 = arith.constant dense<0.000000e+00> : vector<8xf32>
    %50 = vector.multi_reduction <add>, %49, %cst_21 [1] : vector<8x8xf32> to vector<8xf32>
    %51 = vector.shape_cast %50 : vector<8xf32> to vector<8x1xf32>
    %52 = tpu.reciprocal %51 {approx = true} : vector<8x1xf32> -> vector<8x1xf32>
    %53 = vector.broadcast %52 : vector<8x1xf32> to vector<8x8xf32>
    %54 = arith.mulf %49, %53 : vector<8x8xf32>
    %55 = arith.truncf %54 : vector<8x8xf32> to vector<8x8xbf16>
    %56 = arith.truncf %39 : vector<8x8xf32> to vector<8x8xbf16>
    %cst_22 = arith.constant dense<0.000000e+00> : vector<8x8xf32>
    %57 = tpu.matmul %55, %56, %cst_22 {dimension_numbers = #tpu.dot_dimension_numbers<[1], [0], [0], [1], [0, 0, 1, 1], [], []>} : vector<8x8xbf16>, vector<8x8xbf16>, vector<8x8xf32> -> vector<8x8xf32>
    %58 = vector.extract_strided_slice %13 {offsets = [0, 16], sizes = [8, 8], strides = [1, 1]} : vector<8x32xf32> to vector<8x8xf32>
    %59 = vector.extract_strided_slice %14 {offsets = [0, 16], sizes = [8, 8], strides = [1, 1]} : vector<8x32xf32> to vector<8x8xf32>
    %60 = vector.extract_strided_slice %15 {offsets = [0, 16], sizes = [8, 8], strides = [1, 1]} : vector<8x32xf32> to vector<8x8xf32>
    %61 = arith.truncf %58 : vector<8x8xf32> to vector<8x8xbf16>
    %62 = arith.truncf %59 : vector<8x8xf32> to vector<8x8xbf16>
    %cst_23 = arith.constant dense<0.000000e+00> : vector<8x8xf32>
    %63 = tpu.matmul %61, %62, %cst_23 {dimension_numbers = #tpu.dot_dimension_numbers<[1], [1], [0], [0], [0, 0, 1, 0], [], []>} : vector<8x8xbf16>, vector<8x8xbf16>, vector<8x8xf32> -> vector<8x8xf32>
    %cst_24 = arith.constant 0.353553385 : f32
    %64 = vector.broadcast %cst_24 : f32 to vector<8x8xf32>
    %65 = arith.mulf %63, %64 : vector<8x8xf32>
    %cst_25 = arith.constant dense<0xFF800000> : vector<8xf32>
    %66 = vector.multi_reduction <maximumf>, %65, %cst_25 [1] : vector<8x8xf32> to vector<8xf32>
    %67 = vector.shape_cast %66 : vector<8xf32> to vector<8x1xf32>
    %68 = vector.broadcast %67 : vector<8x1xf32> to vector<8x8xf32>
    %69 = arith.subf %65, %68 : vector<8x8xf32>
    %70 = math.exp %69 : vector<8x8xf32>
    %cst_26 = arith.constant dense<0.000000e+00> : vector<8xf32>
    %71 = vector.multi_reduction <add>, %70, %cst_26 [1] : vector<8x8xf32> to vector<8xf32>
    %72 = vector.shape_cast %71 : vector<8xf32> to vector<8x1xf32>
    %73 = tpu.reciprocal %72 {approx = true} : vector<8x1xf32> -> vector<8x1xf32>
    %74 = vector.broadcast %73 : vector<8x1xf32> to vector<8x8xf32>
    %75 = arith.mulf %70, %74 : vector<8x8xf32>
    %76 = arith.truncf %75 : vector<8x8xf32> to vector<8x8xbf16>
    %77 = arith.truncf %60 : vector<8x8xf32> to vector<8x8xbf16>
    %cst_27 = arith.constant dense<0.000000e+00> : vector<8x8xf32>
    %78 = tpu.matmul %76, %77, %cst_27 {dimension_numbers = #tpu.dot_dimension_numbers<[1], [0], [0], [1], [0, 0, 1, 1], [], []>} : vector<8x8xbf16>, vector<8x8xbf16>, vector<8x8xf32> -> vector<8x8xf32>
    %79 = vector.extract_strided_slice %13 {offsets = [0, 24], sizes = [8, 8], strides = [1, 1]} : vector<8x32xf32> to vector<8x8xf32>
    %80 = vector.extract_strided_slice %14 {offsets = [0, 24], sizes = [8, 8], strides = [1, 1]} : vector<8x32xf32> to vector<8x8xf32>
    %81 = vector.extract_strided_slice %15 {offsets = [0, 24], sizes = [8, 8], strides = [1, 1]} : vector<8x32xf32> to vector<8x8xf32>
    %82 = arith.truncf %79 : vector<8x8xf32> to vector<8x8xbf16>
    %83 = arith.truncf %80 : vector<8x8xf32> to vector<8x8xbf16>
    %cst_28 = arith.constant dense<0.000000e+00> : vector<8x8xf32>
    %84 = tpu.matmul %82, %83, %cst_28 {dimension_numbers = #tpu.dot_dimension_numbers<[1], [1], [0], [0], [0, 0, 1, 0], [], []>} : vector<8x8xbf16>, vector<8x8xbf16>, vector<8x8xf32> -> vector<8x8xf32>
    %cst_29 = arith.constant 0.353553385 : f32
    %85 = vector.broadcast %cst_29 : f32 to vector<8x8xf32>
    %86 = arith.mulf %84, %85 : vector<8x8xf32>
    %cst_30 = arith.constant dense<0xFF800000> : vector<8xf32>
    %87 = vector.multi_reduction <maximumf>, %86, %cst_30 [1] : vector<8x8xf32> to vector<8xf32>
    %88 = vector.shape_cast %87 : vector<8xf32> to vector<8x1xf32>
    %89 = vector.broadcast %88 : vector<8x1xf32> to vector<8x8xf32>
    %90 = arith.subf %86, %89 : vector<8x8xf32>
    %91 = math.exp %90 : vector<8x8xf32>
    %cst_31 = arith.constant dense<0.000000e+00> : vector<8xf32>
    %92 = vector.multi_reduction <add>, %91, %cst_31 [1] : vector<8x8xf32> to vector<8xf32>
    %93 = vector.shape_cast %92 : vector<8xf32> to vector<8x1xf32>
    %94 = tpu.reciprocal %93 {approx = true} : vector<8x1xf32> -> vector<8x1xf32>
    %95 = vector.broadcast %94 : vector<8x1xf32> to vector<8x8xf32>
    %96 = arith.mulf %91, %95 : vector<8x8xf32>
    %97 = arith.truncf %96 : vector<8x8xf32> to vector<8x8xbf16>
    %98 = arith.truncf %81 : vector<8x8xf32> to vector<8x8xbf16>
    %cst_32 = arith.constant dense<0.000000e+00> : vector<8x8xf32>
    %99 = tpu.matmul %97, %98, %cst_32 {dimension_numbers = #tpu.dot_dimension_numbers<[1], [0], [0], [1], [0, 0, 1, 1], [], []>} : vector<8x8xbf16>, vector<8x8xbf16>, vector<8x8xf32> -> vector<8x8xf32>
    %100 = tpu.concatenate %36, %57, %78, %99 in 1 : vector<8x8xf32>, vector<8x8xf32>, vector<8x8xf32>, vector<8x8xf32> -> vector<8x32xf32>
    %c0_33 = arith.constant 0 : index
    %c0_34 = arith.constant 0 : index
    %101 = vector.load %arg5[%c0_33, %c0_34] : memref<32x32xf32, #tpu.memory_space<vmem>>, vector<32x32xf32>
    %102 = arith.truncf %100 : vector<8x32xf32> to vector<8x32xbf16>
    %103 = arith.truncf %101 : vector<32x32xf32> to vector<32x32xbf16>
    %cst_35 = arith.constant dense<0.000000e+00> : vector<8x32xf32>
    %104 = tpu.matmul %102, %103, %cst_35 {dimension_numbers = #tpu.dot_dimension_numbers<[1], [0], [0], [1], [0, 0, 1, 1], [], []>} : vector<8x32xbf16>, vector<32x32xbf16>, vector<8x32xf32> -> vector<8x32xf32>
    %c0_36 = arith.constant 0 : index
    %c0_37 = arith.constant 0 : index
    %105 = vector.load %arg6[%c0_36, %c0_37] : memref<1x32xf32, #tpu.memory_space<vmem>>, vector<1x32xf32>
    %106 = vector.broadcast %105 : vector<1x32xf32> to vector<8x32xf32>
    %107 = arith.addf %104, %106 : vector<8x32xf32>
    %108 = vector.extract_strided_slice %4 {offsets = [0, 0], sizes = [1, 32], strides = [1, 1]} : vector<3x32xf32> to vector<1x32xf32>
    %109 = vector.extract_strided_slice %5 {offsets = [0, 0], sizes = [1, 32], strides = [1, 1]} : vector<3x32xf32> to vector<1x32xf32>
    %110 = arith.addf %1, %107 : vector<8x32xf32>
    %cst_38 = arith.constant dense<0.000000e+00> : vector<8xf32>
    %111 = vector.multi_reduction <add>, %110, %cst_38 [1] : vector<8x32xf32> to vector<8xf32>
    %112 = vector.shape_cast %111 : vector<8xf32> to vector<8x1xf32>
    %cst_39 = arith.constant 3.200000e+01 : f32
    %113 = vector.broadcast %cst_39 : f32 to vector<8x1xf32>
    %114 = arith.divf %112, %113 : vector<8x1xf32>
    %115 = vector.broadcast %114 : vector<8x1xf32> to vector<8x32xf32>
    %116 = arith.subf %110, %115 : vector<8x32xf32>
    %117 = vector.broadcast %114 : vector<8x1xf32> to vector<8x32xf32>
    %118 = arith.subf %110, %117 : vector<8x32xf32>
    %119 = arith.mulf %116, %118 : vector<8x32xf32>
    %cst_40 = arith.constant dense<0.000000e+00> : vector<8xf32>
    %120 = vector.multi_reduction <add>, %119, %cst_40 [1] : vector<8x32xf32> to vector<8xf32>
    %121 = vector.shape_cast %120 : vector<8xf32> to vector<8x1xf32>
    %cst_41 = arith.constant 3.200000e+01 : f32
    %122 = vector.broadcast %cst_41 : f32 to vector<8x1xf32>
    %123 = arith.divf %121, %122 : vector<8x1xf32>
    %124 = vector.broadcast %114 : vector<8x1xf32> to vector<8x32xf32>
    %125 = arith.subf %110, %124 : vector<8x32xf32>
    %cst_42 = arith.constant 9.99999974E-6 : f32
    %126 = vector.broadcast %cst_42 : f32 to vector<8x1xf32>
    %127 = arith.addf %123, %126 : vector<8x1xf32>
    %128 = math.rsqrt %127 : vector<8x1xf32>
    %129 = vector.broadcast %128 : vector<8x1xf32> to vector<8x32xf32>
    %130 = arith.mulf %125, %129 : vector<8x32xf32>
    %131 = vector.broadcast %108 : vector<1x32xf32> to vector<8x32xf32>
    %132 = arith.mulf %130, %131 : vector<8x32xf32>
    %133 = vector.broadcast %109 : vector<1x32xf32> to vector<8x32xf32>
    %134 = arith.addf %132, %133 : vector<8x32xf32>
    %c0_43 = arith.constant 0 : index
    %c0_44 = arith.constant 0 : index
    %135 = vector.load %arg7[%c0_43, %c0_44] : memref<32x32xf32, #tpu.memory_space<vmem>>, vector<32x32xf32>
    %136 = arith.truncf %134 : vector<8x32xf32> to vector<8x32xbf16>
    %137 = arith.truncf %135 : vector<32x32xf32> to vector<32x32xbf16>
    %cst_45 = arith.constant dense<0.000000e+00> : vector<8x32xf32>
    %138 = tpu.matmul %136, %137, %cst_45 {dimension_numbers = #tpu.dot_dimension_numbers<[1], [0], [0], [1], [0, 0, 1, 1], [], []>} : vector<8x32xbf16>, vector<32x32xbf16>, vector<8x32xf32> -> vector<8x32xf32>
    %c0_46 = arith.constant 0 : index
    %c0_47 = arith.constant 0 : index
    %139 = vector.load %arg8[%c0_46, %c0_47] : memref<1x32xf32, #tpu.memory_space<vmem>>, vector<1x32xf32>
    %140 = vector.broadcast %139 : vector<1x32xf32> to vector<8x32xf32>
    %141 = arith.addf %138, %140 : vector<8x32xf32>
    %c0_48 = arith.constant 0 : index
    %c0_49 = arith.constant 0 : index
    %142 = vector.load %arg9[%c0_48, %c0_49] : memref<32x64xf32, #tpu.memory_space<vmem>>, vector<32x64xf32>
    %143 = arith.truncf %3 : vector<12x32xf32> to vector<12x32xbf16>
    %144 = arith.truncf %142 : vector<32x64xf32> to vector<32x64xbf16>
    %cst_50 = arith.constant dense<0.000000e+00> : vector<12x64xf32>
    %145 = tpu.matmul %143, %144, %cst_50 {dimension_numbers = #tpu.dot_dimension_numbers<[1], [0], [0], [1], [0, 0, 1, 1], [], []>} : vector<12x32xbf16>, vector<32x64xbf16>, vector<12x64xf32> -> vector<12x64xf32>
    %c0_51 = arith.constant 0 : index
    %c0_52 = arith.constant 0 : index
    %146 = vector.load %arg10[%c0_51, %c0_52] : memref<1x64xf32, #tpu.memory_space<vmem>>, vector<1x64xf32>
    %147 = vector.broadcast %146 : vector<1x64xf32> to vector<12x64xf32>
    %148 = arith.addf %145, %147 : vector<12x64xf32>
    %149 = vector.extract_strided_slice %148 {offsets = [0, 0], sizes = [12, 32], strides = [1, 1]} : vector<12x64xf32> to vector<12x32xf32>
    %150 = vector.extract_strided_slice %148 {offsets = [0, 32], sizes = [12, 32], strides = [1, 1]} : vector<12x64xf32> to vector<12x32xf32>
    %151 = vector.extract_strided_slice %141 {offsets = [0, 0], sizes = [8, 8], strides = [1, 1]} : vector<8x32xf32> to vector<8x8xf32>
    %152 = vector.extract_strided_slice %149 {offsets = [0, 0], sizes = [12, 8], strides = [1, 1]} : vector<12x32xf32> to vector<12x8xf32>
    %153 = vector.extract_strided_slice %150 {offsets = [0, 0], sizes = [12, 8], strides = [1, 1]} : vector<12x32xf32> to vector<12x8xf32>
    %154 = arith.truncf %151 : vector<8x8xf32> to vector<8x8xbf16>
    %155 = arith.truncf %152 : vector<12x8xf32> to vector<12x8xbf16>
    %cst_53 = arith.constant dense<0.000000e+00> : vector<8x12xf32>
    %156 = tpu.matmul %154, %155, %cst_53 {dimension_numbers = #tpu.dot_dimension_numbers<[1], [1], [0], [0], [0, 0, 1, 0], [], []>} : vector<8x8xbf16>, vector<12x8xbf16>, vector<8x12xf32> -> vector<8x12xf32>
    %cst_54 = arith.constant 0.353553385 : f32
    %157 = vector.broadcast %cst_54 : f32 to vector<8x12xf32>
    %158 = arith.mulf %156, %157 : vector<8x12xf32>
    %cst_55 = arith.constant dense<0xFF800000> : vector<8xf32>
    %159 = vector.multi_reduction <maximumf>, %158, %cst_55 [1] : vector<8x12xf32> to vector<8xf32>
    %160 = vector.shape_cast %159 : vector<8xf32> to vector<8x1xf32>
    %161 = vector.broadcast %160 : vector<8x1xf32> to vector<8x12xf32>
    %162 = arith.subf %158, %161 : vector<8x12xf32>
    %163 = math.exp %162 : vector<8x12xf32>
    %cst_56 = arith.constant dense<0.000000e+00> : vector<8xf32>
    %164 = vector.multi_reduction <add>, %163, %cst_56 [1] : vector<8x12xf32> to vector<8xf32>
    %165 = vector.shape_cast %164 : vector<8xf32> to vector<8x1xf32>
    %166 = tpu.reciprocal %165 {approx = true} : vector<8x1xf32> -> vector<8x1xf32>
    %167 = vector.broadcast %166 : vector<8x1xf32> to vector<8x12xf32>
    %168 = arith.mulf %163, %167 : vector<8x12xf32>
    %169 = arith.truncf %168 : vector<8x12xf32> to vector<8x12xbf16>
    %170 = arith.truncf %153 : vector<12x8xf32> to vector<12x8xbf16>
    %cst_57 = arith.constant dense<0.000000e+00> : vector<8x8xf32>
    %171 = tpu.matmul %169, %170, %cst_57 {dimension_numbers = #tpu.dot_dimension_numbers<[1], [0], [0], [1], [0, 0, 1, 1], [], []>} : vector<8x12xbf16>, vector<12x8xbf16>, vector<8x8xf32> -> vector<8x8xf32>
    %172 = vector.extract_strided_slice %141 {offsets = [0, 8], sizes = [8, 8], strides = [1, 1]} : vector<8x32xf32> to vector<8x8xf32>
    %173 = vector.extract_strided_slice %149 {offsets = [0, 8], sizes = [12, 8], strides = [1, 1]} : vector<12x32xf32> to vector<12x8xf32>
    %174 = vector.extract_strided_slice %150 {offsets = [0, 8], sizes = [12, 8], strides = [1, 1]} : vector<12x32xf32> to vector<12x8xf32>
    %175 = arith.truncf %172 : vector<8x8xf32> to vector<8x8xbf16>
    %176 = arith.truncf %173 : vector<12x8xf32> to vector<12x8xbf16>
    %cst_58 = arith.constant dense<0.000000e+00> : vector<8x12xf32>
    %177 = tpu.matmul %175, %176, %cst_58 {dimension_numbers = #tpu.dot_dimension_numbers<[1], [1], [0], [0], [0, 0, 1, 0], [], []>} : vector<8x8xbf16>, vector<12x8xbf16>, vector<8x12xf32> -> vector<8x12xf32>
    %cst_59 = arith.constant 0.353553385 : f32
    %178 = vector.broadcast %cst_59 : f32 to vector<8x12xf32>
    %179 = arith.mulf %177, %178 : vector<8x12xf32>
    %cst_60 = arith.constant dense<0xFF800000> : vector<8xf32>
    %180 = vector.multi_reduction <maximumf>, %179, %cst_60 [1] : vector<8x12xf32> to vector<8xf32>
    %181 = vector.shape_cast %180 : vector<8xf32> to vector<8x1xf32>
    %182 = vector.broadcast %181 : vector<8x1xf32> to vector<8x12xf32>
    %183 = arith.subf %179, %182 : vector<8x12xf32>
    %184 = math.exp %183 : vector<8x12xf32>
    %cst_61 = arith.constant dense<0.000000e+00> : vector<8xf32>
    %185 = vector.multi_reduction <add>, %184, %cst_61 [1] : vector<8x12xf32> to vector<8xf32>
    %186 = vector.shape_cast %185 : vector<8xf32> to vector<8x1xf32>
    %187 = tpu.reciprocal %186 {approx = true} : vector<8x1xf32> -> vector<8x1xf32>
    %188 = vector.broadcast %187 : vector<8x1xf32> to vector<8x12xf32>
    %189 = arith.mulf %184, %188 : vector<8x12xf32>
    %190 = arith.truncf %189 : vector<8x12xf32> to vector<8x12xbf16>
    %191 = arith.truncf %174 : vector<12x8xf32> to vector<12x8xbf16>
    %cst_62 = arith.constant dense<0.000000e+00> : vector<8x8xf32>
    %192 = tpu.matmul %190, %191, %cst_62 {dimension_numbers = #tpu.dot_dimension_numbers<[1], [0], [0], [1], [0, 0, 1, 1], [], []>} : vector<8x12xbf16>, vector<12x8xbf16>, vector<8x8xf32> -> vector<8x8xf32>
    %193 = vector.extract_strided_slice %141 {offsets = [0, 16], sizes = [8, 8], strides = [1, 1]} : vector<8x32xf32> to vector<8x8xf32>
    %194 = vector.extract_strided_slice %149 {offsets = [0, 16], sizes = [12, 8], strides = [1, 1]} : vector<12x32xf32> to vector<12x8xf32>
    %195 = vector.extract_strided_slice %150 {offsets = [0, 16], sizes = [12, 8], strides = [1, 1]} : vector<12x32xf32> to vector<12x8xf32>
    %196 = arith.truncf %193 : vector<8x8xf32> to vector<8x8xbf16>
    %197 = arith.truncf %194 : vector<12x8xf32> to vector<12x8xbf16>
    %cst_63 = arith.constant dense<0.000000e+00> : vector<8x12xf32>
    %198 = tpu.matmul %196, %197, %cst_63 {dimension_numbers = #tpu.dot_dimension_numbers<[1], [1], [0], [0], [0, 0, 1, 0], [], []>} : vector<8x8xbf16>, vector<12x8xbf16>, vector<8x12xf32> -> vector<8x12xf32>
    %cst_64 = arith.constant 0.353553385 : f32
    %199 = vector.broadcast %cst_64 : f32 to vector<8x12xf32>
    %200 = arith.mulf %198, %199 : vector<8x12xf32>
    %cst_65 = arith.constant dense<0xFF800000> : vector<8xf32>
    %201 = vector.multi_reduction <maximumf>, %200, %cst_65 [1] : vector<8x12xf32> to vector<8xf32>
    %202 = vector.shape_cast %201 : vector<8xf32> to vector<8x1xf32>
    %203 = vector.broadcast %202 : vector<8x1xf32> to vector<8x12xf32>
    %204 = arith.subf %200, %203 : vector<8x12xf32>
    %205 = math.exp %204 : vector<8x12xf32>
    %cst_66 = arith.constant dense<0.000000e+00> : vector<8xf32>
    %206 = vector.multi_reduction <add>, %205, %cst_66 [1] : vector<8x12xf32> to vector<8xf32>
    %207 = vector.shape_cast %206 : vector<8xf32> to vector<8x1xf32>
    %208 = tpu.reciprocal %207 {approx = true} : vector<8x1xf32> -> vector<8x1xf32>
    %209 = vector.broadcast %208 : vector<8x1xf32> to vector<8x12xf32>
    %210 = arith.mulf %205, %209 : vector<8x12xf32>
    %211 = arith.truncf %210 : vector<8x12xf32> to vector<8x12xbf16>
    %212 = arith.truncf %195 : vector<12x8xf32> to vector<12x8xbf16>
    %cst_67 = arith.constant dense<0.000000e+00> : vector<8x8xf32>
    %213 = tpu.matmul %211, %212, %cst_67 {dimension_numbers = #tpu.dot_dimension_numbers<[1], [0], [0], [1], [0, 0, 1, 1], [], []>} : vector<8x12xbf16>, vector<12x8xbf16>, vector<8x8xf32> -> vector<8x8xf32>
    %214 = vector.extract_strided_slice %141 {offsets = [0, 24], sizes = [8, 8], strides = [1, 1]} : vector<8x32xf32> to vector<8x8xf32>
    %215 = vector.extract_strided_slice %149 {offsets = [0, 24], sizes = [12, 8], strides = [1, 1]} : vector<12x32xf32> to vector<12x8xf32>
    %216 = vector.extract_strided_slice %150 {offsets = [0, 24], sizes = [12, 8], strides = [1, 1]} : vector<12x32xf32> to vector<12x8xf32>
    %217 = arith.truncf %214 : vector<8x8xf32> to vector<8x8xbf16>
    %218 = arith.truncf %215 : vector<12x8xf32> to vector<12x8xbf16>
    %cst_68 = arith.constant dense<0.000000e+00> : vector<8x12xf32>
    %219 = tpu.matmul %217, %218, %cst_68 {dimension_numbers = #tpu.dot_dimension_numbers<[1], [1], [0], [0], [0, 0, 1, 0], [], []>} : vector<8x8xbf16>, vector<12x8xbf16>, vector<8x12xf32> -> vector<8x12xf32>
    %cst_69 = arith.constant 0.353553385 : f32
    %220 = vector.broadcast %cst_69 : f32 to vector<8x12xf32>
    %221 = arith.mulf %219, %220 : vector<8x12xf32>
    %cst_70 = arith.constant dense<0xFF800000> : vector<8xf32>
    %222 = vector.multi_reduction <maximumf>, %221, %cst_70 [1] : vector<8x12xf32> to vector<8xf32>
    %223 = vector.shape_cast %222 : vector<8xf32> to vector<8x1xf32>
    %224 = vector.broadcast %223 : vector<8x1xf32> to vector<8x12xf32>
    %225 = arith.subf %221, %224 : vector<8x12xf32>
    %226 = math.exp %225 : vector<8x12xf32>
    %cst_71 = arith.constant dense<0.000000e+00> : vector<8xf32>
    %227 = vector.multi_reduction <add>, %226, %cst_71 [1] : vector<8x12xf32> to vector<8xf32>
    %228 = vector.shape_cast %227 : vector<8xf32> to vector<8x1xf32>
    %229 = tpu.reciprocal %228 {approx = true} : vector<8x1xf32> -> vector<8x1xf32>
    %230 = vector.broadcast %229 : vector<8x1xf32> to vector<8x12xf32>
    %231 = arith.mulf %226, %230 : vector<8x12xf32>
    %232 = arith.truncf %231 : vector<8x12xf32> to vector<8x12xbf16>
    %233 = arith.truncf %216 : vector<12x8xf32> to vector<12x8xbf16>
    %cst_72 = arith.constant dense<0.000000e+00> : vector<8x8xf32>
    %234 = tpu.matmul %232, %233, %cst_72 {dimension_numbers = #tpu.dot_dimension_numbers<[1], [0], [0], [1], [0, 0, 1, 1], [], []>} : vector<8x12xbf16>, vector<12x8xbf16>, vector<8x8xf32> -> vector<8x8xf32>
    %235 = tpu.concatenate %171, %192, %213, %234 in 1 : vector<8x8xf32>, vector<8x8xf32>, vector<8x8xf32>, vector<8x8xf32> -> vector<8x32xf32>
    %c0_73 = arith.constant 0 : index
    %c0_74 = arith.constant 0 : index
    %236 = vector.load %arg11[%c0_73, %c0_74] : memref<32x32xf32, #tpu.memory_space<vmem>>, vector<32x32xf32>
    %237 = arith.truncf %235 : vector<8x32xf32> to vector<8x32xbf16>
    %238 = arith.truncf %236 : vector<32x32xf32> to vector<32x32xbf16>
    %cst_75 = arith.constant dense<0.000000e+00> : vector<8x32xf32>
    %239 = tpu.matmul %237, %238, %cst_75 {dimension_numbers = #tpu.dot_dimension_numbers<[1], [0], [0], [1], [0, 0, 1, 1], [], []>} : vector<8x32xbf16>, vector<32x32xbf16>, vector<8x32xf32> -> vector<8x32xf32>
    %c0_76 = arith.constant 0 : index
    %c0_77 = arith.constant 0 : index
    %240 = vector.load %arg12[%c0_76, %c0_77] : memref<1x32xf32, #tpu.memory_space<vmem>>, vector<1x32xf32>
    %241 = vector.broadcast %240 : vector<1x32xf32> to vector<8x32xf32>
    %242 = arith.addf %239, %241 : vector<8x32xf32>
    %243 = vector.extract_strided_slice %4 {offsets = [1, 0], sizes = [1, 32], strides = [1, 1]} : vector<3x32xf32> to vector<1x32xf32>
    %244 = vector.extract_strided_slice %5 {offsets = [1, 0], sizes = [1, 32], strides = [1, 1]} : vector<3x32xf32> to vector<1x32xf32>
    %245 = arith.addf %134, %242 : vector<8x32xf32>
    %cst_78 = arith.constant dense<0.000000e+00> : vector<8xf32>
    %246 = vector.multi_reduction <add>, %245, %cst_78 [1] : vector<8x32xf32> to vector<8xf32>
    %247 = vector.shape_cast %246 : vector<8xf32> to vector<8x1xf32>
    %cst_79 = arith.constant 3.200000e+01 : f32
    %248 = vector.broadcast %cst_79 : f32 to vector<8x1xf32>
    %249 = arith.divf %247, %248 : vector<8x1xf32>
    %250 = vector.broadcast %249 : vector<8x1xf32> to vector<8x32xf32>
    %251 = arith.subf %245, %250 : vector<8x32xf32>
    %252 = vector.broadcast %249 : vector<8x1xf32> to vector<8x32xf32>
    %253 = arith.subf %245, %252 : vector<8x32xf32>
    %254 = arith.mulf %251, %253 : vector<8x32xf32>
    %cst_80 = arith.constant dense<0.000000e+00> : vector<8xf32>
    %255 = vector.multi_reduction <add>, %254, %cst_80 [1] : vector<8x32xf32> to vector<8xf32>
    %256 = vector.shape_cast %255 : vector<8xf32> to vector<8x1xf32>
    %cst_81 = arith.constant 3.200000e+01 : f32
    %257 = vector.broadcast %cst_81 : f32 to vector<8x1xf32>
    %258 = arith.divf %256, %257 : vector<8x1xf32>
    %259 = vector.broadcast %249 : vector<8x1xf32> to vector<8x32xf32>
    %260 = arith.subf %245, %259 : vector<8x32xf32>
    %cst_82 = arith.constant 9.99999974E-6 : f32
    %261 = vector.broadcast %cst_82 : f32 to vector<8x1xf32>
    %262 = arith.addf %258, %261 : vector<8x1xf32>
    %263 = math.rsqrt %262 : vector<8x1xf32>
    %264 = vector.broadcast %263 : vector<8x1xf32> to vector<8x32xf32>
    %265 = arith.mulf %260, %264 : vector<8x32xf32>
    %266 = vector.broadcast %243 : vector<1x32xf32> to vector<8x32xf32>
    %267 = arith.mulf %265, %266 : vector<8x32xf32>
    %268 = vector.broadcast %244 : vector<1x32xf32> to vector<8x32xf32>
    %269 = arith.addf %267, %268 : vector<8x32xf32>
    %c0_83 = arith.constant 0 : index
    %c0_84 = arith.constant 0 : index
    %270 = vector.load %arg13[%c0_83, %c0_84] : memref<32x64xf32, #tpu.memory_space<vmem>>, vector<32x64xf32>
    %271 = arith.truncf %269 : vector<8x32xf32> to vector<8x32xbf16>
    %272 = arith.truncf %270 : vector<32x64xf32> to vector<32x64xbf16>
    %cst_85 = arith.constant dense<0.000000e+00> : vector<8x64xf32>
    %273 = tpu.matmul %271, %272, %cst_85 {dimension_numbers = #tpu.dot_dimension_numbers<[1], [0], [0], [1], [0, 0, 1, 1], [], []>} : vector<8x32xbf16>, vector<32x64xbf16>, vector<8x64xf32> -> vector<8x64xf32>
    %c0_86 = arith.constant 0 : index
    %c0_87 = arith.constant 0 : index
    %274 = vector.load %arg14[%c0_86, %c0_87] : memref<1x64xf32, #tpu.memory_space<vmem>>, vector<1x64xf32>
    %275 = vector.broadcast %274 : vector<1x64xf32> to vector<8x64xf32>
    %276 = arith.addf %273, %275 : vector<8x64xf32>
    %cst_88 = arith.constant 0.000000e+00 : f32
    %277 = vector.broadcast %cst_88 : f32 to vector<8x64xf32>
    %278 = arith.maximumf %276, %277 : vector<8x64xf32>
    %c0_89 = arith.constant 0 : index
    %c0_90 = arith.constant 0 : index
    %279 = vector.load %arg15[%c0_89, %c0_90] : memref<64x32xf32, #tpu.memory_space<vmem>>, vector<64x32xf32>
    %280 = arith.truncf %278 : vector<8x64xf32> to vector<8x64xbf16>
    %281 = arith.truncf %279 : vector<64x32xf32> to vector<64x32xbf16>
    %cst_91 = arith.constant dense<0.000000e+00> : vector<8x32xf32>
    %282 = tpu.matmul %280, %281, %cst_91 {dimension_numbers = #tpu.dot_dimension_numbers<[1], [0], [0], [1], [0, 0, 1, 1], [], []>} : vector<8x64xbf16>, vector<64x32xbf16>, vector<8x32xf32> -> vector<8x32xf32>
    %c0_92 = arith.constant 0 : index
    %c0_93 = arith.constant 0 : index
    %283 = vector.load %arg16[%c0_92, %c0_93] : memref<1x32xf32, #tpu.memory_space<vmem>>, vector<1x32xf32>
    %284 = vector.broadcast %283 : vector<1x32xf32> to vector<8x32xf32>
    %285 = arith.addf %282, %284 : vector<8x32xf32>
    %286 = vector.extract_strided_slice %4 {offsets = [2, 0], sizes = [1, 32], strides = [1, 1]} : vector<3x32xf32> to vector<1x32xf32>
    %287 = vector.extract_strided_slice %5 {offsets = [2, 0], sizes = [1, 32], strides = [1, 1]} : vector<3x32xf32> to vector<1x32xf32>
    %288 = arith.addf %269, %285 : vector<8x32xf32>
    %cst_94 = arith.constant dense<0.000000e+00> : vector<8xf32>
    %289 = vector.multi_reduction <add>, %288, %cst_94 [1] : vector<8x32xf32> to vector<8xf32>
    %290 = vector.shape_cast %289 : vector<8xf32> to vector<8x1xf32>
    %cst_95 = arith.constant 3.200000e+01 : f32
    %291 = vector.broadcast %cst_95 : f32 to vector<8x1xf32>
    %292 = arith.divf %290, %291 : vector<8x1xf32>
    %293 = vector.broadcast %292 : vector<8x1xf32> to vector<8x32xf32>
    %294 = arith.subf %288, %293 : vector<8x32xf32>
    %295 = vector.broadcast %292 : vector<8x1xf32> to vector<8x32xf32>
    %296 = arith.subf %288, %295 : vector<8x32xf32>
    %297 = arith.mulf %294, %296 : vector<8x32xf32>
    %cst_96 = arith.constant dense<0.000000e+00> : vector<8xf32>
    %298 = vector.multi_reduction <add>, %297, %cst_96 [1] : vector<8x32xf32> to vector<8xf32>
    %299 = vector.shape_cast %298 : vector<8xf32> to vector<8x1xf32>
    %cst_97 = arith.constant 3.200000e+01 : f32
    %300 = vector.broadcast %cst_97 : f32 to vector<8x1xf32>
    %301 = arith.divf %299, %300 : vector<8x1xf32>
    %302 = vector.broadcast %292 : vector<8x1xf32> to vector<8x32xf32>
    %303 = arith.subf %288, %302 : vector<8x32xf32>
    %cst_98 = arith.constant 9.99999974E-6 : f32
    %304 = vector.broadcast %cst_98 : f32 to vector<8x1xf32>
    %305 = arith.addf %301, %304 : vector<8x1xf32>
    %306 = math.rsqrt %305 : vector<8x1xf32>
    %307 = vector.broadcast %306 : vector<8x1xf32> to vector<8x32xf32>
    %308 = arith.mulf %303, %307 : vector<8x32xf32>
    %309 = vector.broadcast %286 : vector<1x32xf32> to vector<8x32xf32>
    %310 = arith.mulf %308, %309 : vector<8x32xf32>
    %311 = vector.broadcast %287 : vector<1x32xf32> to vector<8x32xf32>
    %312 = arith.addf %310, %311 : vector<8x32xf32>
    %c0_99 = arith.constant 0 : index
    %c0_100 = arith.constant 0 : index
    %c0_101 = arith.constant 0 : index
    %313 = vector.load %arg19[%c0_99, %c0_100, %c0_101] : memref<1x8x32xf32, #tpu.memory_space<vmem>>, vector<1x8x32xf32>
    %314 = vector.shape_cast %313 : vector<1x8x32xf32> to vector<8x32xf32>
    %315 = vector.shape_cast %312 : vector<8x32xf32> to vector<1x8x32xf32>
    tpu.vector_store %arg19[%c0_99, %c0_100, %c0_101], %315 {strides = array<i32>} : memref<1x8x32xf32, #tpu.memory_space<vmem>>, vector<1x8x32xf32>,
    return
  }
  func.func @transform_0(%arg0: i32) -> (i32, i32, i32) {
    %c0_i32 = arith.constant 0 : i32
    %c0_i32_0 = arith.constant 0 : i32
    %c0_i32_1 = arith.constant 0 : i32
    return %arg0, %c0_i32, %c0_i32_0 : i32, i32, i32
  }
  func.func @transform_1(%arg0: i32) -> (i32, i32, i32) {
    %c0_i32 = arith.constant 0 : i32
    %c0_i32_0 = arith.constant 0 : i32
    %c0_i32_1 = arith.constant 0 : i32
    return %arg0, %c0_i32, %c0_i32_0 : i32, i32, i32
  }
  func.func @transform_2(%arg0: i32) -> (i32, i32) {
    %c0_i32 = arith.constant 0 : i32
    %c0_i32_0 = arith.constant 0 : i32
    %c0_i32_1 = arith.constant 0 : i32
    return %c0_i32, %c0_i32_0 : i32, i32
  }
  func.func @transform_3(%arg0: i32) -> (i32, i32) {
    %c0_i32 = arith.constant 0 : i32
    %c0_i32_0 = arith.constant 0 : i32
    %c0_i32_1 = arith.constant 0 : i32
    return %c0_i32, %c0_i32_0 : i32, i32
  }
  func.func @transform_4(%arg0: i32) -> (i32, i32) {
    %c0_i32 = arith.constant 0 : i32
    %c0_i32_0 = arith.constant 0 : i32
    %c0_i32_1 = arith.constant 0 : i32
    return %c0_i32, %c0_i32_0 : i32, i32
  }
  func.func @transform_5(%arg0: i32) -> (i32, i32) {
    %c0_i32 = arith.constant 0 : i32
    %c0_i32_0 = arith.constant 0 : i32
    %c0_i32_1 = arith.constant 0 : i32
    return %c0_i32, %c0_i32_0 : i32, i32
  }
  func.func @transform_6(%arg0: i32) -> (i32, i32) {
    %c0_i32 = arith.constant 0 : i32
    %c0_i32_0 = arith.constant 0 : i32
    %c0_i32_1 = arith.constant 0 : i32
    return %c0_i32, %c0_i32_0 : i32, i32
  }
  func.func @transform_7(%arg0: i32) -> (i32, i32) {
    %c0_i32 = arith.constant 0 : i32
    %c0_i32_0 = arith.constant 0 : i32
    %c0_i32_1 = arith.constant 0 : i32
    return %c0_i32, %c0_i32_0 : i32, i32
  }
  func.func @transform_8(%arg0: i32) -> (i32, i32) {
    %c0_i32 = arith.constant 0 : i32
    %c0_i32_0 = arith.constant 0 : i32
    %c0_i32_1 = arith.constant 0 : i32
    return %c0_i32, %c0_i32_0 : i32, i32
  }
  func.func @transform_9(%arg0: i32) -> (i32, i32) {
    %c0_i32 = arith.constant 0 : i32
    %c0_i32_0 = arith.constant 0 : i32
    %c0_i32_1 = arith.constant 0 : i32
    return %c0_i32, %c0_i32_0 : i32, i32
  }
  func.func @transform_10(%arg0: i32) -> (i32, i32) {
    %c0_i32 = arith.constant 0 : i32
    %c0_i32_0 = arith.constant 0 : i32
    %c0_i32_1 = arith.constant 0 : i32
    return %c0_i32, %c0_i32_0 : i32, i32
  }
  func.func @transform_11(%arg0: i32) -> (i32, i32) {
    %c0_i32 = arith.constant 0 : i32
    %c0_i32_0 = arith.constant 0 : i32
    %c0_i32_1 = arith.constant 0 : i32
    return %c0_i32, %c0_i32_0 : i32, i32
  }
  func.func @transform_12(%arg0: i32) -> (i32, i32) {
    %c0_i32 = arith.constant 0 : i32
    %c0_i32_0 = arith.constant 0 : i32
    %c0_i32_1 = arith.constant 0 : i32
    return %c0_i32, %c0_i32_0 : i32, i32
  }
  func.func @transform_13(%arg0: i32) -> (i32, i32) {
    %c0_i32 = arith.constant 0 : i32
    %c0_i32_0 = arith.constant 0 : i32
    %c0_i32_1 = arith.constant 0 : i32
    return %c0_i32, %c0_i32_0 : i32, i32
  }
  func.func @transform_14(%arg0: i32) -> (i32, i32) {
    %c0_i32 = arith.constant 0 : i32
    %c0_i32_0 = arith.constant 0 : i32
    %c0_i32_1 = arith.constant 0 : i32
    return %c0_i32, %c0_i32_0 : i32, i32
  }
  func.func @transform_15(%arg0: i32) -> (i32, i32) {
    %c0_i32 = arith.constant 0 : i32
    %c0_i32_0 = arith.constant 0 : i32
    %c0_i32_1 = arith.constant 0 : i32
    return %c0_i32, %c0_i32_0 : i32, i32
  }
  func.func @transform_16(%arg0: i32) -> (i32, i32) {
    %c0_i32 = arith.constant 0 : i32
    %c0_i32_0 = arith.constant 0 : i32
    %c0_i32_1 = arith.constant 0 : i32
    return %c0_i32, %c0_i32_0 : i32, i32
  }
  func.func @transform_17(%arg0: i32) -> (i32, i32) {
    %c0_i32 = arith.constant 0 : i32
    %c0_i32_0 = arith.constant 0 : i32
    %c0_i32_1 = arith.constant 0 : i32
    return %c0_i32, %c0_i32_0 : i32, i32
  }
  func.func @transform_18(%arg0: i32) -> (i32, i32, i32) {
    %c0_i32 = arith.constant 0 : i32
    %c0_i32_0 = arith.constant 0 : i32
    %c0_i32_1 = arith.constant 0 : i32
    return %arg0, %c0_i32, %c0_i32_0 : i32, i32, i32
  }
}

</mosaic_0001>

<bundles_post_ra>
// kernel: transformer_decoder_layer.1
= control target key start
LH: loop header
LB: loop body
LE: loop exit
PB: predicated region body
PF: predicated region fallthrough
CT: control target
= control target key end

     0   :  { %s3973_s0 = inlined_call_operand.hbm [shape: f32[2,8,32], index: 0, kind: input, shape index: {}]   ;;  %s3974_s1 = inlined_call_operand.vmem [shape: f32[2,12,32], index: 1, kind: input, shape index: {}]   ;;  %s3975_s2 = inlined_call_operand.vmem [shape: f32[32,96], index: 2, kind: input, shape index: {}]   ;;  %s3976_s3 = inlined_call_operand.vmem [shape: f32[1,96], index: 3, kind: input, shape index: {}]   ;;  %s3977_s4 = inlined_call_operand.vmem [shape: f32[32,32], index: 4, kind: input, shape index: {}]   ;;  %s3978_s5 = inlined_call_operand.hbm [shape: f32[1,32], index: 5, kind: input, shape index: {}]   ;;  %s3979_s6 = inlined_call_operand.vmem [shape: f32[32,32], index: 6, kind: input, shape index: {}]   ;;  %s3980_s7 = inlined_call_operand.hbm [shape: f32[1,32], index: 7, kind: input, shape index: {}]   ;;  %s3981_s8 = inlined_call_operand.vmem [shape: f32[32,64], index: 8, kind: input, shape index: {}]   ;;  %s3982_s9 = inlined_call_operand.hbm [shape: f32[1,64], index: 9, kind: input, shape index: {}]   ;;  %s3983_s10 = inlined_call_operand.vmem [shape: f32[32,32], index: 10, kind: input, shape index: {}]   ;;  %s3984_s11 = inlined_call_operand.hbm [shape: f32[1,32], index: 11, kind: input, shape index: {}]   ;;  %s3985_s12 = inlined_call_operand.hbm [shape: f32[32,64], index: 12, kind: input, shape index: {}]   ;;  %s3986_s13 = inlined_call_operand.hbm [shape: f32[1,64], index: 13, kind: input, shape index: {}]   ;;  %s3987_s14 = inlined_call_operand.vmem [shape: f32[64,32], index: 14, kind: input, shape index: {}]   ;;  %s3988_s15 = inlined_call_operand.hbm [shape: f32[1,32], index: 15, kind: input, shape index: {}]   ;;  %s3989_s16 = inlined_call_operand.hbm [shape: f32[3,32], index: 16, kind: input, shape index: {}]   ;;  %s3990_s17 = inlined_call_operand.hbm [shape: f32[3,32], index: 17, kind: input, shape index: {}]   ;;  %s3991_s18 = inlined_call_operand.hbm [shape: f32[2,8,32], index: 18, kind: output, shape index: {}]  }
   0x1   :  { %4020 = sst [smem:[#allocation27_spill]] %s3973_s0 }
   0x2   :  { %4021 = sst [smem:[#allocation28_spill]] %s3974_s1 }
   0x3   :  { %4022 = sst [smem:[#allocation29_spill]] %s3975_s2 }
   0x4   :  { %4023 = sst [smem:[#allocation30_spill]] %s3976_s3 }
   0x5   :  { %4024 = sst [smem:[#allocation31_spill]] %s3977_s4 }
   0x6   :  { %4025 = sst [smem:[#allocation32_spill]] %s3978_s5 }
   0x7   :  { %4026 = sst [smem:[#allocation33_spill]] %s3979_s6 }
   0x8   :  { %4027 = sst [smem:[#allocation34_spill]] %s3980_s7 }
   0x9   :  { %4028 = sst [smem:[#allocation35_spill]] %s3981_s8 }
   0xa   :  { %4029 = sst [smem:[#allocation36_spill]] %s3982_s9 }
   0xb   :  { %4030 = sst [smem:[#allocation37_spill]] %s3983_s10 }
   0xc   :  { %4031 = sst [smem:[#allocation38_spill]] %s3987_s14 }
   0xd   :  { %4032 = sst [smem:[#allocation39_spill]] %s3991_s18 }
   0xe   :  { %23 = vsyncpa [#allocation3], 0 }
   0xf   :  { %25 = vsyncpa [#allocation3 + $0x1], 0 }
  0x10   :  { %26 = vsyncpa [#allocation6], 0 }
  0x11   :  { %27 = vsyncpa [#allocation9], 0 }
  0x12   :  { %28 = vsyncpa [#allocation12], 0 }
  0x13   :  { %29 = vsyncpa [#allocation15], 0 }
  0x14   :  { %30 = vsyncpa [#allocation18], 0 }
  0x15   :  { %31 = vsyncpa [#allocation4], 0 }
  0x16   :  { %33 = vsyncpa [#allocation4 + $0x1], 0  ;;  %s3282_s27 = smov 0   ;;  %s3284_s28 = smov 0  }
  0x17   :  { %s3286_s29 = smov 0   ;;  %s3288_s30 = smov 0  }
  0x18 LB: > { %s3158_s0 = smov [#allocation5]   ;;  %s3303_s1 = sadd.s32 4294967295, %s3156_s30   ;;  %s3156_s30 = sphi %s3288_s30, %s4082_s30   ;;  %s3152_s29 = sphi %s3286_s29, %s4081_s29   ;;  %s3148_s28 = sphi %s3284_s28, %s4080_s28   ;;  %s3144_s27 = sphi %s3282_s27, %s4079_s27  }
  0x19   : > { %s480_s19 = sshll.u32 %s3158_s0, 4  ;;  %p2322_p0 = scmp.ge.s32.totalorder %s3156_s30, 1  ;;  %s3308_s19 = int_to_ptr.vmem [resolvable:$true] %s480_s19 }
  0x1a   : > { %p4000_p1 = scmp.eq.s32.totalorder %s3303_s1, 0  ;;  %p458_p2 = scmp.lt.s32.totalorder %s3156_s30, 3 }
  0x1b   : > { %s3159_s21 = smov [#allocation8]   ;;  %s3160_s2 = smov [#allocation11]  }
  0x1c   : > { %p3310_p3 = pnand %p2322_p0, %p458_p2  ;;  %s508_s22 = sshll.u32 %s3159_s21, 4  ;;  %s3317_s22 = int_to_ptr.vmem [resolvable:$true] %s508_s22 }
  0x1d   : > { %s532_s23 = sshll.u32 %s3160_s2, 4  ;;  %s4035_s5 = sld [smem:[#allocation32_spill]]  ;;  %s3325_s23 = int_to_ptr.vmem [resolvable:$true] %s532_s23 }
  0x1e   : > { %s4033_s20 = scalar_select %p3310_p3, 1, 0 }
  0x1f   : > { %p2635_p5 = pneg %p3310_p3 }
  0x21   : > { %p3321_p6 = pnand %p2635_p5, %p4000_p1 }
  0x23   : > { %s2788_s0 = scalar_lea.hbm %s4035_s5, 16  ;;  %p3335_p8 = pneg %p3321_p6 }
  0x24   : > { %p2789_p7 = scmp.ne.s32.totalorder %s4035_s5, %s2788_s0  ;;  %p2795_p11 = scmp.lt.u32.totalorder %s2788_s0, %s4035_s5 }
  0x26   : > { %p2791_p9 = pnand %p3335_p8, %p2789_p7 }
  0x28   : > { %p2792_p10 = pneg %p2791_p9 }
  0x2a   : > { %p2797_p12 = pnand %p2795_p11, %p2792_p10 }
  0x2c   : > { %2800 = shalt.err (!%p2797_p12)
}
  0x2d   : > { %s2801_s14 = scalar_lea.vmem %s3308_s19, 16  ;;  %s2808_s18 = scalar_lea.vmem %s3308_s19, 32 }
  0x2e   : > { %p2802_p13 = scmp.ne.s32.totalorder %s3308_s19, %s2801_s14  ;;  %p2809_p5 = scmp.lt.s32.totalorder %s3308_s19, %s3308_s19 }
  0x2f   : > { %p2810_p7 = scmp.lt.s32.totalorder %s2808_s18, %s2801_s14 }
  0x30   : > { %p2804_p0 = pnand %p2802_p13, %p3335_p8 }
  0x31   : > { %p2811_p9 = por %p2810_p7, %p2809_p5 }
  0x32   : > { %p2805_p2 = pneg %p2804_p0 }
  0x34   : > { %p2812_p4 = pnand %p2811_p9, %p2805_p2 }
  0x36   : > { %2815 = shalt.err (!%p2812_p4)
}
  0x37   : > { %2638 = dma.hbm_to_vmem [thread:$0]  (!%p3321_p6), %s4035_s5, 16, %s3308_s19, [#allocation6]  }
  0x38   : > { %s4037_s9 = sld [smem:[#allocation36_spill]] }
  0x3e   : > { %s2816_s2 = scalar_lea.hbm %s4037_s9, 16 }
  0x3f   : > { %p2817_p10 = scmp.ne.s32.totalorder %s4037_s9, %s2816_s2  ;;  %p2823_p4 = scmp.lt.u32.totalorder %s2816_s2, %s4037_s9 }
  0x41   : > { %p2819_p11 = pnand %p2817_p10, %p3335_p8 }
  0x43   : > { %p2820_p12 = pneg %p2819_p11 }
  0x45   : > { %p2825_p13 = pnand %p2823_p4, %p2820_p12 }
  0x47   : > { %2828 = shalt.err (!%p2825_p13)
}
  0x48   : > { %s2829_s19 = scalar_lea.vmem %s3317_s22, 16  ;;  %s2836_s6 = scalar_lea.vmem %s3317_s22, 32 }
  0x49   : > { %p2830_p0 = scmp.ne.s32.totalorder %s3317_s22, %s2829_s19  ;;  %p2837_p7 = scmp.lt.s32.totalorder %s3317_s22, %s3317_s22 }
  0x4a   : > { %p2838_p9 = scmp.lt.s32.totalorder %s2836_s6, %s2829_s19 }
  0x4b   : > { %p2832_p2 = pnand %p2830_p0, %p3335_p8 }
  0x4c   : > { %p2839_p10 = por %p2838_p9, %p2837_p7 }
  0x4d   : > { %p2833_p5 = pneg %p2832_p2 }
  0x4f   : > { %p2840_p11 = pnand %p2839_p10, %p2833_p5 }
  0x51   : > { %2843 = shalt.err (!%p2840_p11)
}
  0x52   : > { %2644 = dma.hbm_to_vmem [thread:$0]  (!%p3321_p6), %s4037_s9, 16, %s3317_s22, [#allocation9]  }
  0x53   : > { %s2844_s0 = scalar_lea.hbm %s3985_s12, 512 }
  0x54   : > { %p2845_p12 = scmp.ne.s32.totalorder %s3985_s12, %s2844_s0  ;;  %p2851_p0 = scmp.lt.u32.totalorder %s2844_s0, %s3985_s12 }
  0x56   : > { %p2847_p4 = pnand %p2845_p12, %p3335_p8 }
  0x58   : > { %p2848_p13 = pneg %p2847_p4 }
  0x5a   : > { %p2853_p2 = pnand %p2851_p0, %p2848_p13 }
  0x5c   : > { %2856 = shalt.err (!%p2853_p2)
}
  0x5d   : > { %s2857_s22 = scalar_lea.vmem %s3325_s23, 512  ;;  %p2865_p10 = scmp.lt.s32.totalorder %s3325_s23, %s3325_s23 }
  0x5e   : > { %p2858_p5 = scmp.ne.s32.totalorder %s3325_s23, %s2857_s22  ;;  %p2866_p11 = scmp.lt.s32.totalorder %s2857_s22, %s2857_s22 }
  0x60   : > { %p2860_p7 = pnand %p2858_p5, %p3335_p8  ;;  %p2867_p12 = por %p2866_p11, %p2865_p10 }
  0x62   : > { %p2861_p9 = pneg %p2860_p7 }
  0x64   : > { %p2868_p4 = pnand %p2867_p12, %p2861_p9 }
  0x66   : > { %2871 = shalt.err (!%p2868_p4)
}
  0x67   : > { %s3161_s6 = smov 128   ;;  %s3162_s8 = smov 8  }
  0x68   : > { %2650 = dma.hbm_to_vmem [thread:$0]  (!%p3321_p6), %s3985_s12, 512, %s3325_s23, [#allocation12], %s3161_s6, %s3161_s6, %s3162_s8  }
  0x69   : > { %s3163_s26 = smov [#allocation14]   ;;  %s3164_s2 = smov [#allocation7]  }
  0x6a   : > { %s560_s0 = sshll.u32 %s3163_s26, 4  ;;  %s494_s14 = sshll.u32 %s3164_s2, 4  ;;  %s561_s0 = int_to_ptr.vmem [resolvable:$true] %s560_s0  ;;  %s495_s14 = int_to_ptr.vmem [resolvable:$true] %s494_s14 }
  0x6b   : > { %s2872_s22 = scalar_lea.hbm %s3988_s15, 16 }
  0x6c   : > { %p2873_p13 = scmp.ne.s32.totalorder %s3988_s15, %s2872_s22  ;;  %p2879_p5 = scmp.lt.u32.totalorder %s2872_s22, %s3988_s15 }
  0x6e   : > { %p2875_p0 = pnand %p2873_p13, %p3335_p8 }
  0x70   : > { %p2876_p2 = pneg %p2875_p0 }
  0x72   : > { %p2881_p7 = pnand %p2879_p5, %p2876_p2 }
  0x74   : > { %2884 = shalt.err (!%p2881_p7)
}
  0x75   : > { %s2885_s23 = scalar_lea.vmem %s561_s0, 16  ;;  %s2892_s6 = scalar_lea.vmem %s561_s0, 32 }
  0x76   : > { %p2886_p9 = scmp.ne.s32.totalorder %s561_s0, %s2885_s23  ;;  %p2893_p12 = scmp.lt.s32.totalorder %s561_s0, %s561_s0 }
  0x77   : > { %p2894_p4 = scmp.lt.s32.totalorder %s2892_s6, %s2885_s23 }
  0x78   : > { %p2888_p10 = pnand %p2886_p9, %p3335_p8 }
  0x79   : > { %p2895_p1 = por %p2894_p4, %p2893_p12 }
  0x7a   : > { %p2889_p11 = pneg %p2888_p10 }
  0x7c   : > { %p2896_p3 = pnand %p2895_p1, %p2889_p11 }
  0x7e   : > { %2899 = shalt.err (!%p2896_p3)
}
  0x7f   : > { %2656 = dma.hbm_to_vmem [thread:$0]  (!%p3321_p6), %s3988_s15, 16, %s561_s0, [#allocation15]  }
  0x80   : > { %s4038_s7 = sld [smem:[#allocation34_spill]] }
  0x86   : > { %s2900_s8 = scalar_lea.hbm %s4038_s7, 16 }
  0x87   : > { %p2901_p13 = scmp.ne.s32.totalorder %s4038_s7, %s2900_s8  ;;  %p2907_p3 = scmp.lt.u32.totalorder %s2900_s8, %s4038_s7 }
  0x89   : > { %p2903_p0 = pnand %p2901_p13, %p3335_p8 }
  0x8b   : > { %p2904_p1 = pneg %p2903_p0 }
  0x8d   : > { %p2909_p2 = pnand %p2907_p3, %p2904_p1 }
  0x8f   : > { %2912 = shalt.err (!%p2909_p2)
}
  0x90   : > { %s2913_s18 = scalar_lea.vmem %s495_s14, 16  ;;  %s2920_s0 = scalar_lea.vmem %s495_s14, 32 }
  0x91   : > { %p2914_p5 = scmp.ne.s32.totalorder %s495_s14, %s2913_s18  ;;  %p2921_p10 = scmp.lt.s32.totalorder %s495_s14, %s495_s14 }
  0x92   : > { %p2922_p11 = scmp.lt.s32.totalorder %s2920_s0, %s2913_s18 }
  0x93   : > { %p2916_p7 = pnand %p2914_p5, %p3335_p8 }
  0x94   : > { %p2923_p12 = por %p2922_p11, %p2921_p10 }
  0x95   : > { %p2917_p9 = pneg %p2916_p7 }
  0x97   : > { %p2924_p4 = pnand %p2923_p12, %p2917_p9 }
  0x99   : > { %2927 = shalt.err (!%p2924_p4)
}
  0x9a   : > { %2641 = dma.hbm_to_vmem [thread:$0]  (!%p3321_p6), %s4038_s7, 16, %s495_s14, [#allocation6]  }
  0x9b   : > { %s3165_s23 = smov [#allocation10]   ;;  %s3166_s5 = smov [#allocation13]  }
  0x9c   : > { %s522_s6 = sshll.u32 %s3165_s23, 4  ;;  %s546_s9 = sshll.u32 %s3166_s5, 4  ;;  %s523_s6 = int_to_ptr.vmem [resolvable:$true] %s522_s6  ;;  %s547_s9 = int_to_ptr.vmem [resolvable:$true] %s546_s9 }
  0x9d   : > { %s2928_s8 = scalar_lea.hbm %s3984_s11, 16 }
  0x9e   : > { %p2929_p13 = scmp.ne.s32.totalorder %s3984_s11, %s2928_s8  ;;  %p2935_p3 = scmp.lt.u32.totalorder %s2928_s8, %s3984_s11 }
  0xa0   : > { %p2931_p0 = pnand %p2929_p13, %p3335_p8 }
  0xa2   : > { %p2932_p1 = pneg %p2931_p0 }
  0xa4   : > { %p2937_p2 = pnand %p2935_p3, %p2932_p1 }
  0xa6   : > { %2940 = shalt.err (!%p2937_p2)
}
  0xa7   : > { %s2941_s14 = scalar_lea.vmem %s523_s6, 16  ;;  %s2948_s18 = scalar_lea.vmem %s523_s6, 32 }
  0xa8   : > { %p2942_p5 = scmp.ne.s32.totalorder %s523_s6, %s2941_s14  ;;  %p2949_p10 = scmp.lt.s32.totalorder %s523_s6, %s523_s6 }
  0xa9   : > { %p2950_p11 = scmp.lt.s32.totalorder %s2948_s18, %s2941_s14 }
  0xaa   : > { %p2944_p7 = pnand %p2942_p5, %p3335_p8 }
  0xab   : > { %p2951_p12 = por %p2950_p11, %p2949_p10 }
  0xac   : > { %p2945_p9 = pneg %p2944_p7 }
  0xae   : > { %p2952_p4 = pnand %p2951_p12, %p2945_p9 }
  0xb0   : > { %2955 = shalt.err (!%p2952_p4)
}
  0xb1   : > { %2647 = dma.hbm_to_vmem [thread:$0]  (!%p3321_p6), %s3984_s11, 16, %s523_s6, [#allocation9]  }
  0xb2   : > { %s2956_s5 = scalar_lea.hbm %s3986_s13, 16 }
  0xb3   : > { %p2957_p13 = scmp.ne.s32.totalorder %s3986_s13, %s2956_s5  ;;  %p2963_p3 = scmp.lt.u32.totalorder %s2956_s5, %s3986_s13 }
  0xb5   : > { %p2959_p0 = pnand %p2957_p13, %p3335_p8 }
  0xb7   : > { %p2960_p1 = pneg %p2959_p0 }
  0xb9   : > { %p2965_p2 = pnand %p2963_p3, %p2960_p1 }
  0xbb   : > { %2968 = shalt.err (!%p2965_p2)
}
  0xbc   : > { %s2969_s25 = scalar_lea.vmem %s547_s9, 16  ;;  %s2976_s6 = scalar_lea.vmem %s547_s9, 32 }
  0xbd   : > { %p2970_p5 = scmp.ne.s32.totalorder %s547_s9, %s2969_s25  ;;  %p2977_p10 = scmp.lt.s32.totalorder %s547_s9, %s547_s9 }
  0xbe   : > { %p2978_p11 = scmp.lt.s32.totalorder %s2976_s6, %s2969_s25 }
  0xbf   : > { %p2972_p7 = pnand %p2970_p5, %p3335_p8 }
  0xc0   : > { %p2979_p12 = por %p2978_p11, %p2977_p10 }
  0xc1   : > { %p2973_p9 = pneg %p2972_p7 }
  0xc3   : > { %p2980_p4 = pnand %p2979_p12, %p2973_p9 }
  0xc5   : > { %2983 = shalt.err (!%p2980_p4)
}
  0xc6   : > { %2653 = dma.hbm_to_vmem [thread:$0]  (!%p3321_p6), %s3986_s13, 16, %s547_s9, [#allocation12]  }
  0xc7   : > { %s3167_s14 = smov [#allocation16]   ;;  %s3168_s0 = smov [#allocation17]  }
  0xc8   : > { %s571_s18 = sshll.u32 %s3167_s14, 4  ;;  %s582_s19 = sshll.u32 %s3168_s0, 4  ;;  %s572_s18 = int_to_ptr.vmem [resolvable:$true] %s571_s18  ;;  %s583_s19 = int_to_ptr.vmem [resolvable:$true] %s582_s19 }
  0xc9   : > { %s2984_s5 = scalar_lea.hbm %s3989_s16, 64 }
  0xca   : > { %p2985_p13 = scmp.ne.s32.totalorder %s3989_s16, %s2984_s5  ;;  %p2991_p3 = scmp.lt.u32.totalorder %s2984_s5, %s3989_s16 }
  0xcc   : > { %p2987_p0 = pnand %p2985_p13, %p3335_p8 }
  0xce   : > { %p2988_p1 = pneg %p2987_p0 }
  0xd0   : > { %p2993_p2 = pnand %p2991_p3, %p2988_p1 }
  0xd2   : > { %2996 = shalt.err (!%p2993_p2)
}
  0xd3   : > { %s2997_s9 = scalar_lea.vmem %s572_s18, 64  ;;  %p3005_p10 = scmp.lt.s32.totalorder %s572_s18, %s572_s18 }
  0xd4   : > { %p2998_p5 = scmp.ne.s32.totalorder %s572_s18, %s2997_s9  ;;  %p3006_p11 = scmp.lt.s32.totalorder %s2997_s9, %s2997_s9 }
  0xd6   : > { %p3000_p7 = pnand %p2998_p5, %p3335_p8  ;;  %p3007_p12 = por %p3006_p11, %p3005_p10 }
  0xd8   : > { %p3001_p9 = pneg %p3000_p7 }
  0xda   : > { %p3008_p4 = pnand %p3007_p12, %p3001_p9 }
  0xdc   : > { %3011 = shalt.err (!%p3008_p4)
}
  0xdd   : > { %2659 = dma.hbm_to_vmem [thread:$0]  (!%p3321_p6), %s3989_s16, 64, %s572_s18, [#allocation15]  }
  0xde   : > { %s3012_s14 = scalar_lea.hbm %s3990_s17, 64 }
  0xdf   : > { %p3013_p13 = scmp.ne.s32.totalorder %s3990_s17, %s3012_s14  ;;  %p3019_p3 = scmp.lt.u32.totalorder %s3012_s14, %s3990_s17 }
  0xe1   : > { %p3015_p0 = pnand %p3013_p13, %p3335_p8 }
  0xe3   : > { %p3016_p1 = pneg %p3015_p0 }
  0xe5   : > { %p3021_p2 = pnand %p3019_p3, %p3016_p1 }
  0xe7   : > { %3024 = shalt.err (!%p3021_p2)
}
  0xe8   : > { %s3025_s3 = scalar_lea.vmem %s583_s19, 64  ;;  %p3033_p10 = scmp.lt.s32.totalorder %s583_s19, %s583_s19 }
  0xe9   : > { %p3026_p5 = scmp.ne.s32.totalorder %s583_s19, %s3025_s3  ;;  %p3034_p11 = scmp.lt.s32.totalorder %s3025_s3, %s3025_s3 }
  0xeb   : > { %p3028_p7 = pnand %p3026_p5, %p3335_p8  ;;  %p3035_p12 = por %p3034_p11, %p3033_p10 }
  0xed   : > { %p3029_p9 = pneg %p3028_p7 }
  0xef   : > { %p3036_p4 = pnand %p3035_p12, %p3029_p9 }
  0xf1   : > { %3039 = shalt.err (!%p3036_p4)
}
  0xf2   : > { %2662 = dma.hbm_to_vmem [thread:$0]  (!%p3321_p6), %s3990_s17, 64, %s583_s19, [#allocation18]  }
  0xf3   : > { %s2321_s21 = sadd.s32 4294967294, %s3156_s30   ;;  %s3514_s24 = sadd.s32 1, %s3156_s30  }
  0xf4   : > { %s46_s8 = sadd.s32 1, %s3152_s29  ;;  %s43_s10 = ssub.s32 %s3156_s30, %s3514_s24 }
  0xf5   : > { %p53_p8 = scmp.ne.s32.totalorder %s3152_s29, %s3148_s28  ;;  %p44_p13 = scmp.eq.s32.totalorder %s43_s10, 0 }
  0xf6   : > { %p54_p0 = scmp.eq.s32.totalorder %s3156_s30, 0  ;;  %p59_p1 = scmp.ne.s32.totalorder %s3148_s28, %s3144_s27 }
  0xf7   : > { %p445_p3 = scmp.eq.s32.totalorder %s3303_s1, 1  ;;  %p4039_p5 = scmp.eq.s32.totalorder %s3303_s1, 0 }
  0xf8   : > { %s3526_s9 = scalar_select %p44_p13, %s3152_s29, %s46_s8  }
  0xf9   : > { %p55_p2 = por %p54_p0, %p53_p8  ;;  %p3530_p7 = por %p4039_p5, %p59_p1 }
  0xfa   : > { %p3534_p6 = por %p445_p3, %p53_p8  ;;  %p451_p9 = scmp.eq.s32.totalorder %s2321_s21, 1 }
  0xfb   : > { %p2680_p10 = scmp.lt.s32.totalorder %s3156_s30, 2  ;;  %s593_s6 = sand.u32 1, %s3152_s29  }
  0xfc   : > { %s4041_s19 = scalar_select %p3534_p6, 1, 0 }
  0xfd   : > { %p3540_p11 = por %p451_p9, %p59_p1  ;;  %s2333_s2 = sshll.u32 %s593_s6, 3 }
  0xfe   : > { %s2334_s14 = sshll.u32 %s3156_s30, 7  ;;  %s4043_s23 = sld [smem:[#allocation27_spill]] }
  0xff   : > { %s4042_s26 = scalar_select %p3540_p11, 1, 0 }
 0x100   : > { %s597_s3 = scalar_lea.vmem [#allocation2], %s2333_s2  ;;  %p3550_p12 = pnand %p2680_p10, %p55_p2 }
 0x101   : > { %s604_s18 = sshll.u32 %s597_s3, 4  ;;  %s594_s21 = scalar_lea.sflag [#allocation3], %s593_s6  ;;  %s3554_s18 = int_to_ptr.vmem [resolvable:$true] %s604_s18 }
 0x102   : > { %p3042_p8 = pneg %p3550_p12 }
 0x104   : > { %s3548_s5 = scalar_lea.hbm %s4043_s23, %s2334_s14  ;;  %s3045_s14 = scalar_lea.hbm %s4043_s23, 256 }
 0x105   : > { %s3040_s8 = scalar_lea.hbm %s3548_s5, 128  ;;  %p3046_p1 = scmp.lt.u32.totalorder %s3548_s5, %s4043_s23 }
 0x106   : > { %p3041_p4 = scmp.ne.s32.totalorder %s3548_s5, %s3040_s8  ;;  %p3047_p3 = scmp.lt.u32.totalorder %s3045_s14, %s3040_s8 }
 0x107   : > { %p3049_p5 = scmp.lt.u32.totalorder %s3040_s8, %s3548_s5 }
 0x108   : > { %p3043_p13 = pnand %p3042_p8, %p3041_p4  ;;  %p3048_p2 = por %p3047_p3, %p3046_p1 }
 0x10a   : > { %p3044_p0 = pneg %p3043_p13  ;;  %p3050_p9 = por %p3049_p5, %p3048_p2 }
 0x10c   : > { %p3051_p10 = pnand %p3050_p9, %p3044_p0 }
 0x10e   : > { %3054 = shalt.err (!%p3051_p10)
}
 0x10f   : > { %s3055_s6 = scalar_lea.vmem %s3554_s18, 128  ;;  %s3169_s3 = smov [#allocation2]  }
 0x110   : > { %p3056_p4 = scmp.ne.s32.totalorder %s3554_s18, %s3055_s6  ;;  %s3060_s10 = sshll.u32 %s3169_s3, 4  ;;  %s3061_s10 = int_to_ptr.vmem [resolvable:$false] %s3060_s10 }
 0x111   : > { %s3062_s2 = scalar_lea.vmem %s3061_s10, 256  ;;  %p3063_p6 = scmp.lt.s32.totalorder %s3554_s18, %s3061_s10 }
 0x112   : > { %p3058_p13 = pnand %p3056_p4, %p3042_p8  ;;  %p3064_p1 = scmp.lt.s32.totalorder %s3062_s2, %s3055_s6 }
 0x114   : > { %p3059_p11 = pneg %p3058_p13  ;;  %p3065_p3 = por %p3064_p1, %p3063_p6 }
 0x116   : > { %p3066_p2 = pnand %p3065_p3, %p3059_p11 }
 0x118   : > { %3069 = shalt.err (!%p3066_p2)
}
 0x119   : > { %2666 = dma.hbm_to_vmem [thread:$0]  (!%p3550_p12), %s3548_s5, 128, %s3554_s18, %s594_s21  }
 0x11a   : > { %p4045_p0 = scmp.ne.s32.totalorder %s4033_s20, 0 }
 0x11b   : > { %s3584_s8 = sand.u32 (!%p4045_p0), 1, %s3148_s28  }
 0x11c   : > { %621 = sbr.rel (%p4045_p0) target bundleno = 4623 (0x120f), region = 92  ;;  %s4003_s14 = sshll.u32 (!%p4045_p0), %s3584_s8, 3 }
 0x11d   : > { %s624_s0 = scalar_lea.sflag (!%p4045_p0), [#allocation3], %s3584_s8  ;;  %s627_s22 = scalar_lea.vmem (!%p4045_p0), [#allocation2], %s4003_s14 }
 0x123   : > { %3115 = dma.done.wait (%p3530_p7), %s624_s0, 128  }
 0x124   : > { %3117 = vsyncadd (%p3530_p7), %s624_s0, 4294967168  ;;  %p4046_p6 = scmp.eq.s32.totalorder %s3303_s1, 0 }
 0x126   : > { %3119 = dma.done.wait (%p4046_p6), [#allocation6], 32   ;;  %p4047_p11 = pmov %p4046_p6 }
 0x127   : > { %p4048_p12 = pmov %p4046_p6 }
 0x128   : > { %3121 = vsyncadd (%p4047_p11), [#allocation6], 4294967264 }
 0x129   : > { %3123 = dma.done.wait (%p4048_p12), [#allocation9], 32   ;;  %p4049_p8 = pmov %p4046_p6 }
 0x12a   : > { %p4050_p5 = pmov %p4046_p6 }
 0x12b   : > { %3125 = vsyncadd (%p4049_p8), [#allocation9], 4294967264 }
 0x12c   : > { %3127 = dma.done.wait (%p4050_p5), [#allocation12], 528   ;;  %p4051_p9 = pmov %p4050_p5 }
 0x12d   : > { %p4052_p7 = pmov %p4050_p5 }
 0x12e   : > { %3129 = vsyncadd (%p4051_p9), [#allocation12], 4294966768 }
 0x12f   : > { %3131 = dma.done.wait (%p4052_p7), [#allocation15], 80   ;;  %p4053_p10 = pmov %p4050_p5 }
 0x130   : > { %p4054_p4 = pmov %p4050_p5 }
 0x131   : > { %3133 = vsyncadd (%p4053_p10), [#allocation15], 4294967216 }
 0x132   : > { %3135 = dma.done.wait (%p4054_p4), [#allocation18], 64   ;;  %p4055_p13 = pmov %p4054_p4 }
 0x133   : > { %v3170_v0 = vmov 0.0   ;;  %vm3171_vm0 = vmmov 0   ;;  %s4056_s5 = sld [smem:[#allocation29_spill]]  ;;  %v3632_v7 = vld [vmem:[%s627_s22] sm:$0xff]  ;;  %vm746_vm1 = vcmask 261120   ;;  %s4057_s20 = sld [smem:[#allocation30_spill]] }
 0x134   : > { %3137 = vsyncadd (%p4055_p13), [#allocation18], 4294967232  ;;  %2439 = vmatprep.subr.bf16.mxu1 %v3170_v0  ;;  %2443 = vmatprep.mubr.msk.bf16.mxu1 %vm3171_vm0, %v3170_v0  ;;  %v736_v8 = vpack.c.bf16 %v3632_v7, %v3632_v7  ;;  %s4015_s22 = smov 120   ;;  %s4008_s25 = smov 96   ;;  %vm794_vm2 = vcmask 64512   ;;  %vm859_vm3 = vcmask 1043456  }
 0x135   : > { %2453 = vmatprep.subr.bf16.mxu0 %v3170_v0  ;;  %2455 = vmatprep.mubr.msk.bf16.mxu0 %vm3171_vm0, %v3170_v0  ;;  %s4006_s18 = smov 80   ;;  %s4004_s4 = smov 88   ;;  %vm1249_vm4 = vcmask 130048   ;;  %vm1251_vm5 = vcmask 195584   ;;  %vm1499_vm6 = vcmask 97280   ;;  %vm1518_vm7 = vcmask 1045504  }
 0x136   : > { %s4005_s21 = smov 72   ;;  %s4013_s6 = smov 112   ;;  %vm2070_vm8 = vcmask 523264  }
 0x137   : > { %s4011_s3 = smov 104   ;;  %s3179_s10 = smov 56  }
 0x138   : > { %s3180_s2 = smov 64   ;;  %s3181_s0 = smov 40  }
 0x139   : > { %v732_v1 = vld [vmem:[%s4056_s5] sm:$0xff]  ;;  %v733_v2 = vld [vmem:[%s4056_s5 + $0x8] sm:$0xff]  ;;  %v734_v3 = vld [vmem:[%s4056_s5 + $0x10] sm:$0xff]  ;;  %s4009_s14 = smov 24   ;;  %p721_p1 = scmp.lt.s32.totalorder %s3303_s1, 1 }
 0x13a   : > { %v737_v4 = vpack.c.bf16 %v733_v2, %v732_v1  ;;  %v735_v5 = vld [vmem:[%s4056_s5 + $0x18] sm:$0xff]  ;;  %v2349_v9 = vld [vmem:[%s4057_s20] ss:$0 sm:$0xff]  ;;  %s3182_s20 = smov 48   ;;  %s2140_s5 = scalar_lea.sflag [#allocation4], %s3584_s8 }
 0x13b   : > { %v738_v6 = vpack.c.bf16 %v735_v5, %v734_v3  ;;  %p4076_p2 = scmp.ne.s32.totalorder %s4041_s19, 0 }
 0x13c   : > { %2440 = vmatpush3.bf16.msra.mxu1 %v737_v4 }
 0x13d   : > { %2441 = vmatprep.subr.bf16.mxu1 %v3170_v0 }
 0x140   : > { %2442 = vmatpush3.bf16.msra.mxu1 %v738_v6 }
 0x141   : > { %2447 = vmatprep.subr.bf16.mxu1 %v3170_v0 }
 0x143   : > { %2444 = vmatmul.mubr.msk.bf16.vlgmr.msra.gmra.mrb[0].mxu1 %vm746_vm1, %v736_v8 }
 0x144   : > { %2449 = vmatprep.mubr.msk.bf16.mxu1 %vm3171_vm0, %v3170_v0 }
 0x216   : > { %v784_v10 = vpop.f32.mrb[0].mxu1 }
 0x217   : > { %v785_v11 = vadd.f32 %v2349_v9, %v784_v10  ;;  %v2445_v12 = vpop.f32.mrb[1].mxu1 }
 0x218   : > { %v787_v13 = vpop.f32.mrb[2].mxu1 }
 0x219   : > { %v3644_v14 = vpack.c.bf16 %v785_v11, %v785_v11  ;;  %v2446_v15 = vpop.f32.mrb[3].mxu1 }
 0x21b   : > { %903 = vrot.lane.b32.xlu1 %v3644_v14, %s4015_s22  ;;  %792 = vrot.lane.b32.xlu0 %v3644_v14, %s4008_s25  ;;  %s4064_s25 = smov 104  }
 0x21f   : > { %1016 = vrot.lane.b32.xlu1 %v3644_v14, %s4006_s18  ;;  %905 = vrot.lane.b32.xlu0 %v3644_v14, %s4004_s4  ;;  %s4059_s4 = sld [smem:[#allocation35_spill]]  ;;  %s4061_s18 = sld [smem:[#allocation33_spill]] }
 0x223   : > { %1127 = vrot.lane.b32.xlu1 %v3644_v14, %s4005_s21  ;;  %1014 = vrot.lane.b32.xlu0 %v3644_v14, %s4013_s6  ;;  %s4060_s6 = sld [smem:[#allocation28_spill]]  ;;  %s4066_s21 = smov 80  }
 0x227   : > { %1125 = vrot.lane.b32.xlu0 %v3644_v14, %s4011_s3 }
 0x28d   : > { %v793_v16 = vpop.permute.xlu0 %792  ;;  %v904_v19 = vpop.permute.xlu1 %903 }
 0x28e   : > { %v799_v17 = vsel %vm794_vm2, %v793_v16, 0 }
 0x28f   : > { %2448 = vmatpush3.bf16.xpose.msra.mxu1 %v799_v17 }
 0x290   : > { %2459 = vmatprep.subr.bf16.mxu1 %v3170_v0 }
 0x291   : > { %v906_v18 = vpop.permute.xlu0 %905  ;;  %v1017_v21 = vpop.permute.xlu1 %1016 }
 0x292   : > { %v911_v20 = vsel %vm794_vm2, %v906_v18, 0  ;;  %v1022_v22 = vsel %vm794_vm2, %v1017_v21, 0 }
 0x295   : > { %v1128_v23 = vpop.permute.xlu1 %1127  ;;  %v1015_v24 = vpop.permute.xlu0 %1014 }
 0x296   : > { %2450 = vmatmul.mubr.msk.bf16.vlgmr.msra.gmra.mrb[4].mxu1 %vm794_vm2, %v3644_v14  ;;  %v1133_v25 = vsel %vm794_vm2, %v1128_v23, 0 }
 0x297   : > { %2460 = vmatpush3.bf16.xpose.msra.mxu1 %v911_v20  ;;  %2461 = vmatprep.mubr.msk.bf16.mxu1 %vm3171_vm0, %v3170_v0 }
 0x298   : > { %2471 = vmatprep.subr.bf16.mxu1 %v3170_v0 }
 0x299   : > { %v1126_v26 = vpop.permute.xlu0 %1125 }
 0x29e   : > { %2462 = vmatmul.mubr.msk.bf16.vlgmr.msra.gmra.mrb[8].mxu1 %vm794_vm2, %v904_v19 }
 0x29f   : > { %2472 = vmatpush3.bf16.xpose.msra.mxu1 %v1022_v22  ;;  %2473 = vmatprep.mubr.msk.bf16.mxu1 %vm3171_vm0, %v3170_v0 }
 0x2a0   : > { %2483 = vmatprep.subr.bf16.mxu1 %v3170_v0 }
 0x2a6   : > { %2474 = vmatmul.mubr.msk.bf16.vlgmr.msra.gmra.mrb[12].mxu1 %vm794_vm2, %v1015_v24 }
 0x2a7   : > { %2484 = vmatpush3.bf16.xpose.msra.mxu1 %v1133_v25  ;;  %2485 = vmatprep.mubr.msk.bf16.mxu1 %vm3171_vm0, %v3170_v0 }
 0x2a8   : > { %2495 = vmatprep.subr.bf16.mxu1 %v3170_v0 }
 0x2ae   : > { %2486 = vmatmul.mubr.msk.bf16.vlgmr.msra.gmra.mrb[16].mxu1 %vm794_vm2, %v1126_v26 }
 0x2af   : > { %2499 = vmatprep.mubr.msk.bf16.mxu1 %vm3171_vm0, %v3170_v0 }
 0x369   : > { %v835_v27 = vpop.f32.mrb[4].mxu1 }
 0x36a   : > { %v841_v28 = vmul.f32 0.35355338, %v835_v27  ;;  %v2451_v29 = vpop.f32.mrb[5].mxu1 }
 0x36b   : > { %v838_v30 = vpop.f32.mrb[6].mxu1 }
 0x36c   : > { %v2452_v31 = vpop.f32.mrb[7].mxu1  ;;  %v842_v32 = vsel %vm794_vm2, %v841_v28, -inf }
 0x36d   : > { %843 = vmax.xlane.f32.xlu1 %v842_v32 }
 0x371   : > { %v947_v33 = vpop.f32.mrb[8].mxu1 }
 0x372   : > { %v953_v34 = vmul.f32 0.35355338, %v947_v33  ;;  %v2463_v35 = vpop.f32.mrb[9].mxu1 }
 0x373   : > { %v950_v36 = vpop.f32.mrb[10].mxu1 }
 0x374   : > { %v2464_v37 = vpop.f32.mrb[11].mxu1  ;;  %v954_v38 = vsel %vm794_vm2, %v953_v34, -inf }
 0x375   : > { %955 = vmax.xlane.f32.xlu0 %v954_v38 }
 0x379   : > { %v1058_v39 = vpop.f32.mrb[12].mxu1 }
 0x37a   : > { %v1064_v40 = vmul.f32 0.35355338, %v1058_v39  ;;  %v2475_v41 = vpop.f32.mrb[13].mxu1 }
 0x37b   : > { %v1061_v42 = vpop.f32.mrb[14].mxu1 }
 0x37c   : > { %v2476_v43 = vpop.f32.mrb[15].mxu1  ;;  %v1065_v44 = vsel %vm794_vm2, %v1064_v40, -inf }
 0x37d   : > { %1066 = vmax.xlane.f32.xlu0 %v1065_v44 }
 0x381   : > { %v1169_v45 = vpop.f32.mrb[16].mxu1 }
 0x382   : > { %v1175_v46 = vmul.f32 0.35355338, %v1169_v45  ;;  %v2487_v47 = vpop.f32.mrb[17].mxu1 }
 0x383   : > { %v1172_v48 = vpop.f32.mrb[18].mxu1 }
 0x384   : > { %v2488_v49 = vpop.f32.mrb[19].mxu1  ;;  %v1176_v50 = vsel %vm794_vm2, %v1175_v46, -inf }
 0x385   : > { %1177 = vmax.xlane.f32.xlu1 %v1176_v50 }
 0x3fa   : > { %v844_v51 = vpop.xlane.xlu1 %843 }
 0x3fb   : > { %v845_v52 = vsub.f32 %v841_v28, %v844_v51 }
 0x3fd   : > { %v846_v53 = vmul.f32 1.442695, %v845_v52 }
 0x3ff   : > { %2750 = vpow2.f32 %v846_v53 }
 0x402   : > { %v956_v54 = vpop.xlane.xlu0 %955 }
 0x403   : > { %v957_v55 = vsub.f32 %v953_v34, %v956_v54 }
 0x405   : > { %v958_v56 = vmul.f32 1.442695, %v957_v55 }
 0x407   : > { %2752 = vpow2.f32 %v958_v56 }
 0x409   : > { %v2751_v57 = vpop.eup %2750 }
 0x40a   : > { %v1067_v58 = vpop.xlane.xlu0 %1066  ;;  %v848_v59 = vsel %vm794_vm2, %v2751_v57, 0.0 }
 0x40b   : > { %v1068_v60 = vsub.f32 %v1064_v40, %v1067_v58  ;;  %849 = vadd.xlane.f32.xlu0 %v848_v59 }
 0x40d   : > { %v1069_v61 = vmul.f32 1.442695, %v1068_v60 }
 0x40f   : > { %2754 = vpow2.f32 %v1069_v61 }
 0x411   : > { %v2753_v62 = vpop.eup %2752 }
 0x412   : > { %v960_v63 = vsel %vm794_vm2, %v2753_v62, 0.0  ;;  %v1178_v3 = vpop.xlane.xlu1 %1177 }
 0x413   : > { %961 = vadd.xlane.f32.xlu1 %v960_v63  ;;  %v1179_v4 = vsub.f32 %v1175_v46, %v1178_v3 }
 0x415   : > { %v1180_v5 = vmul.f32 1.442695, %v1179_v4 }
 0x417   : > { %2756 = vpow2.f32 %v1180_v5 }
 0x419   : > { %v2755_v1 = vpop.eup %2754 }
 0x41a   : > { %v1071_v2 = vsel %vm794_vm2, %v2755_v1, 0.0 }
 0x41b   : > { %1072 = vadd.xlane.f32.xlu0 %v1071_v2 }
 0x421   : > { %v2757_v6 = vpop.eup %2756 }
 0x422   : > { %v1182_v8 = vsel %vm794_vm2, %v2757_v6, 0.0 }
 0x424   : > { %966 = vrot.lane.b32.xlu1 %v3644_v14, %s3179_s10  ;;  %s4007_s10 = smov 8  }
 0x431   : > { %854 = vrot.lane.b32.xlu0 %v3644_v14, %s3180_s2  ;;  %s4010_s2 = smov 16  }
 0x435   : > { %1188 = vrot.lane.b32.xlu0 %v3644_v14, %s3181_s0  ;;  %s722_s0 = scalar_select %p721_p1, %s3303_s1, 1 }
 0x448   : > { %1183 = vadd.xlane.f32.xlu1 %v1182_v8  ;;  %v1392_v8 = vld [vmem:[%s4059_s4] sm:$0xff] }
 0x459   : > { %1077 = vrot.lane.b32.xlu1 %v3644_v14, %s3182_s20  ;;  %s4058_s20 = sld [smem:[#allocation31_spill]] }
 0x45f   : > { %v1253_v41 = vld [vmem:[%s4058_s20] sm:$0xff]  ;;  %v1254_v42 = vld [vmem:[%s4058_s20 + $0x8] sm:$0xff]  ;;  %v1255_v44 = vld [vmem:[%s4058_s20 + $0x10] sm:$0xff] }
 0x460   : > { %v1258_v43 = vpack.c.bf16 %v1254_v42, %v1253_v41  ;;  %v1256_v45 = vld [vmem:[%s4058_s20 + $0x18] sm:$0xff]  ;;  %v2363_v42 = vld [vmem:[#allocation8] ss:$0 sm:$0xff] }
 0x461   : > { %v1259_v46 = vpack.c.bf16 %v1256_v45, %v1255_v44 }
 0x462   : > { %2496 = vmatpush3.bf16.msra.mxu1 %v1258_v43 }
 0x463   : > { %2497 = vmatprep.subr.bf16.mxu1 %v3170_v0 }
 0x466   : > { %2498 = vmatpush3.bf16.msra.mxu1 %v1259_v46 }
 0x467   : > { %2511 = vmatprep.subr.bf16.mxu1 %v3170_v0 }
 0x498   : > { %v850_v9 = vpop.xlane.xlu0 %849 }
 0x499   : > { %2758 = vrcp.f32 %v850_v9  ;;  %v1393_v9 = vld [vmem:[%s4059_s4 + $0x8] sm:$0xff] }
 0x4a0   : > { %v962_v10 = vpop.xlane.xlu1 %961 }
 0x4a1   : > { %2760 = vrcp.f32 %v962_v10  ;;  %v1397_v10 = vpack.c.bf16 %v1393_v9, %v1392_v8 }
 0x4a3   : > { %v2759_v11 = vpop.eup %2758 }
 0x4a4   : > { %v852_v13 = vmul.f32 %v2759_v11, %v2751_v57  ;;  %v967_v17 = vpop.permute.xlu1 %966 }
 0x4a5   : > { %v972_v20 = vsel %vm859_vm3, %v967_v17, 0  ;;  %v1395_v17 = vld [vmem:[%s4059_s4 + $0x18] sm:$0xff] }
 0x4a6   : > { %v853_v18 = vpack.c.bf16 %v852_v13, %v852_v13 }
 0x4a8   : > { %v1073_v12 = vpop.xlane.xlu0 %1072 }
 0x4a9   : > { %2762 = vrcp.f32 %v1073_v12 }
 0x4ab   : > { %v2761_v19 = vpop.eup %2760 }
 0x4ac   : > { %v855_v15 = vpop.permute.xlu0 %854  ;;  %v964_v14 = vmul.f32 %v2761_v19, %v2753_v62  ;;  %v2359_v62 = vld [vmem:[#allocation5] ss:$0 sm:$0xff] }
 0x4ad   : > { %v861_v16 = vsel %vm859_vm3, %v855_v15, 0 }
 0x4ae   : > { %2454 = vmatpush3.bf16.msra.mxu0 %v861_v16  ;;  %v965_v21 = vpack.c.bf16 %v964_v14, %v964_v14  ;;  %v1394_v16 = vld [vmem:[%s4059_s4 + $0x10] sm:$0xff]  ;;  %s2380_s4 = sshll.u32 %s3303_s1, 7  ;;  %s3186_s1 = smov [#allocation19]  }
 0x4af   : > { %2465 = vmatprep.subr.bf16.mxu0 %v3170_v0 }
 0x4b0   : > { %v1189_v27 = vpop.permute.xlu0 %1188 }
 0x4b1   : > { %2456 = vmatmul.mubr.msk.bf16.vlgmr.msra.gmra.mrb[0].mxu0 %vm794_vm2, %v853_v18  ;;  %v1194_v29 = vsel %vm859_vm3, %v1189_v27, 0  ;;  %v1398_v18 = vpack.c.bf16 %v1395_v17, %v1394_v16 }
 0x4b2   : > { %2466 = vmatpush3.bf16.msra.mxu0 %v972_v20  ;;  %2467 = vmatprep.mubr.msk.bf16.mxu0 %vm3171_vm0, %v3170_v0 }
 0x4b3   : > { %2477 = vmatprep.subr.bf16.mxu0 %v3170_v0  ;;  %v2763_v22 = vpop.eup %2762 }
 0x4b4   : > { %v1075_v24 = vmul.f32 %v2763_v22, %v2755_v1  ;;  %v1336_v22 = vld [vmem:[%s4061_s18 + $0x8] sm:$0xff] }
 0x4b6   : > { %v1076_v28 = vpack.c.bf16 %v1075_v24, %v1075_v24  ;;  %v1337_v24 = vld [vmem:[%s4061_s18 + $0x10] sm:$0xff] }
 0x4b9   : > { %2468 = vmatmul.mubr.msk.bf16.vlgmr.msra.gmra.mrb[4].mxu0 %vm794_vm2, %v965_v21  ;;  %v1335_v21 = vld [vmem:[%s4061_s18] sm:$0xff] }
 0x4ba   : > { %2479 = vmatprep.mubr.msk.bf16.mxu0 %vm3171_vm0, %v3170_v0 }
 0x4d5   : > { %v1184_v23 = vpop.xlane.xlu1 %1183 }
 0x4d6   : > { %2764 = vrcp.f32 %v1184_v23  ;;  %v1340_v23 = vpack.c.bf16 %v1336_v22, %v1335_v21 }
 0x4d9   : > { %v1078_v25 = vpop.permute.xlu1 %1077 }
 0x4da   : > { %v1083_v26 = vsel %vm859_vm3, %v1078_v25, 0  ;;  %v1338_v25 = vld [vmem:[%s4061_s18 + $0x18] sm:$0xff] }
 0x4db   : > { %2478 = vmatpush3.bf16.msra.mxu0 %v1083_v26  ;;  %v1341_v26 = vpack.c.bf16 %v1338_v25, %v1337_v24 }
 0x4dc   : > { %2489 = vmatprep.subr.bf16.mxu0 %v3170_v0 }
 0x4de   : > { %2480 = vmatmul.mubr.msk.bf16.vlgmr.msra.gmra.mrb[8].mxu0 %vm794_vm2, %v1076_v28 }
 0x4df   : > { %2490 = vmatpush3.bf16.msra.mxu0 %v1194_v29  ;;  %2491 = vmatprep.mubr.msk.bf16.mxu0 %vm3171_vm0, %v3170_v0  ;;  %v1325_v29 = vlaneseq }
 0x4e0   : > { %v2765_v30 = vpop.eup %2764  ;;  %2503 = vmatprep.subr.bf16.mxu0 %v3170_v0 }
 0x4e1   : > { %v1186_v31 = vmul.f32 %v2765_v30, %v2757_v6 }
 0x4e3   : > { %v1187_v32 = vpack.c.bf16 %v1186_v31, %v1186_v31  ;;  %v3775_v31 = vshrl.u32 %v1325_v29, 7 }
 0x4e6   : > { %2492 = vmatmul.mubr.msk.bf16.vlgmr.msra.gmra.mrb[12].mxu0 %vm794_vm2, %v1187_v32  ;;  %v1327_v32 = vsub.s32 0, %v3775_v31 }
 0x4e7   : > { %2507 = vmatprep.mubr.msk.bf16.mxu0 %vm3171_vm0, %v3170_v0  ;;  %2504 = vmatpush3.bf16.msra.mxu0 %v1340_v23 }
 0x4e8   : > { %2505 = vmatprep.subr.bf16.mxu0 %v3170_v0 }
 0x4eb   : > { %2506 = vmatpush3.bf16.msra.mxu0 %v1341_v26 }
 0x4ec   : > { %2519 = vmatprep.subr.bf16.mxu0 %v3170_v0 }
 0x584   : > { %v897_v33 = vpop.f32.mrb[0].mxu0 }
 0x585   : > { %v2457_v34 = vpop.f32.mrb[1].mxu0 }
 0x586   : > { %v900_v35 = vpop.f32.mrb[2].mxu0  ;;  %v3780_v34 = vld [vmem:[#allocation17] sm:$0x7] }
 0x587   : > { %v2458_v36 = vpop.f32.mrb[3].mxu0 }
 0x58c   : > { %v1008_v37 = vpop.f32.mrb[4].mxu0 }
 0x58d   : > { %1237 = vrot.lane.b32.xlu1 %v1008_v37, %s4007_s10  ;;  %v2469_v38 = vpop.f32.mrb[5].mxu0  ;;  %s2383_s10 = sshll.u32 %s722_s0, 4  ;;  %s4065_s0 = smov 96  }
 0x58e   : > { %v1011_v39 = vpop.f32.mrb[6].mxu0  ;;  %s725_s22 = scalar_lea.vmem %s4060_s6, %s2383_s10  ;;  %v1333_v38 = vrot.slane %v3780_v34, %v1327_v32  ;;  %s4062_s10 = smov 120  }
 0x58f   : > { %v2470_v40 = vpop.f32.mrb[7].mxu0  ;;  %v728_v19 = vld [vmem:[%s725_s22] sm:$0xff]  ;;  %v729_v20 = vld [vmem:[%s725_s22 + $0x8] sm:$0xf]  ;;  %s4067_s22 = smov 72   ;;  %s4068_s6 = smov 88  }
 0x590   : > { %v1396_v14 = vpack.c.bf16 %v729_v20, %v728_v19 }
 0x5b1   : > { %v1119_v47 = vpop.f32.mrb[8].mxu0 }
 0x5b2   : > { %1241 = vrot.lane.b32.xlu0 %v1119_v47, %s4010_s2  ;;  %v2481_v48 = vpop.f32.mrb[9].mxu0  ;;  %s4071_s2 = smov 16  }
 0x5b3   : > { %v1122_v49 = vpop.f32.mrb[10].mxu0 }
 0x5b4   : > { %v2482_v50 = vpop.f32.mrb[11].mxu0 }
 0x5b9   : > { %v1230_v51 = vpop.f32.mrb[12].mxu0 }
 0x5ba   : > { %1245 = vrot.lane.b32.xlu1 %v1230_v51, %s4009_s14  ;;  %v2493_v52 = vpop.f32.mrb[13].mxu0  ;;  %s4063_s14 = smov 112   ;;  %v2361_v51 = vld [vmem:[#allocation7] ss:$0 sm:$0xff] }
 0x5bb   : > { %v1233_v53 = vpop.f32.mrb[14].mxu0 }
 0x5bc   : > { %v2494_v54 = vpop.f32.mrb[15].mxu0 }
 0x5ff   : > { %v1238_v55 = vpop.permute.xlu1 %1237 }
 0x600   : > { %v1248_v57 = vsel %vm794_vm2, %v897_v33, %v1238_v55  ;;  %v3778_v33 = vld [vmem:[#allocation16] sm:$0x7] }
 0x601   : > { %v1328_v35 = vrot.slane %v3778_v33, %v1327_v32 }
 0x624   : > { %v1242_v56 = vpop.permute.xlu0 %1241 }
 0x625   : > { %v1250_v58 = vsel %vm1249_vm4, %v1248_v57, %v1242_v56 }
 0x62c   : > { %v1246_v59 = vpop.permute.xlu1 %1245 }
 0x62d   : > { %v1252_v60 = vsel %vm1251_vm5, %v1250_v58, %v1246_v59 }
 0x62e   : > { %v1257_v61 = vpack.c.bf16 %v1252_v60, %v1252_v60 }
 0x630   : > { %2500 = vmatmul.mubr.msk.bf16.vlgmr.msra.gmra.mrb[20].mxu1 %vm746_vm1, %v1257_v61 }
 0x631   : > { %2515 = vmatprep.mubr.msk.bf16.mxu1 %vm3171_vm0, %v3170_v0  ;;  %2512 = vmatpush3.bf16.msra.mxu1 %v1397_v10 }
 0x632   : > { %2513 = vmatprep.subr.bf16.mxu1 %v3170_v0 }
 0x635   : > { %2514 = vmatpush3.bf16.msra.mxu1 %v1398_v18 }
 0x636   : > { %2525 = vmatprep.subr.bf16.mxu1 %v3170_v0 }
 0x638   : > { %2516 = vmatmul.mubr.msk.bf16.vlgmr.msra.gmra.mrb[24].mxu1 %vm746_vm1, %v1396_v14 }
 0x639   : > { %2527 = vmatprep.mubr.msk.bf16.mxu1 %vm3171_vm0, %v3170_v0 }
 0x703   : > { %v1304_v63 = vpop.f32.mrb[20].mxu1 }
 0x704   : > { %v1305_v1 = vadd.f32 %v2359_v62, %v1304_v63  ;;  %v2501_v2 = vpop.f32.mrb[21].mxu1 }
 0x705   : > { %v1307_v3 = vpop.f32.mrb[22].mxu1 }
 0x706   : > { %v2502_v4 = vpop.f32.mrb[23].mxu1  ;;  %v1310_v5 = vadd.f32 %v1305_v1, %v3632_v7 }
 0x708   : > { %v1311_v6 = vsel %vm746_vm1, %v1310_v5, 0.0 }
 0x709   : > { %1312 = vadd.xlane.f32.xlu0 %v1311_v6 }
 0x70b   : > { %v1443_v43 = vpop.f32.mrb[24].mxu1 }
 0x70c   : > { %v1444_v44 = vadd.f32 %v2363_v42, %v1443_v43  ;;  %v2517_v45 = vpop.f32.mrb[25].mxu1 }
 0x70d   : > { %v1446_v46 = vpop.f32.mrb[26].mxu1 }
 0x70e   : > { %v1447_v47 = vadd.f32 %v2363_v42, %v1446_v46  ;;  %v2518_v48 = vpop.f32.mrb[27].mxu1 }
 0x710   : > { %v3791_v49 = vpack.c.bf16 %v1447_v47, %v1444_v44 }
 0x712   : > { %v1456_v50 = vsel %vm794_vm2, %v3791_v49, 0 }
 0x71f   : > { %1565 = vrot.lane.b32.xlu0 %v3791_v49, %s4062_s10 }
 0x723   : > { %1676 = vrot.lane.b32.xlu0 %v3791_v49, %s4063_s14 }
 0x727   : > { %1787 = vrot.lane.b32.xlu0 %v3791_v49, %s4064_s25 }
 0x796   : > { %v1313_v11 = vpop.xlane.xlu0 %1312 }
 0x797   : > { %v1315_v12 = vmul.f32 0.03125, %v1313_v11 }
 0x799   : > { %v1316_v13 = vsub.f32 %v1310_v5, %v1315_v12 }
 0x79a   : > { %v1566_v56 = vpop.permute.xlu0 %1565 }
 0x79b   : > { %v1317_v15 = vmul.f32 %v1316_v13, %v1316_v13  ;;  %v1571_v59 = vsel %vm794_vm2, %v1566_v56, 0 }
 0x79d   : > { %v1318_v7 = vsel %vm746_vm1, %v1317_v15, 0.0 }
 0x79e   : > { %1319 = vadd.xlane.f32.xlu1 %v1318_v7  ;;  %v1677_v60 = vpop.permute.xlu0 %1676 }
 0x79f   : > { %v1682_v62 = vsel %vm794_vm2, %v1677_v60, 0 }
 0x7a2   : > { %v1788_v63 = vpop.permute.xlu0 %1787 }
 0x7a3   : > { %v1793_v2 = vsel %vm794_vm2, %v1788_v63, 0 }
 0x82b   : > { %v1320_v27 = vpop.xlane.xlu1 %1319 }
 0x82c   : > { %v1321_v28 = vmul.f32 0.03125, %v1320_v27 }
 0x82e   : > { %v1322_v30 = vadd.f32 1e-05, %v1321_v28 }
 0x830   : > { %2766 = vrsqrt.f32 %v1322_v30 }
 0x83a   : > { %v2767_v36 = vpop.eup %2766 }
 0x83b   : > { %v1324_v37 = vmul.f32 %v2767_v36, %v1316_v13 }
 0x83d   : > { %v1329_v39 = vmul.f32 %v1328_v35, %v1324_v37 }
 0x83f   : > { %v3784_v40 = vadd.f32 %v1333_v38, %v1329_v39 }
 0x841   : > { %v1339_v41 = vpack.c.bf16 %v3784_v40, %v3784_v40 }
 0x843   : > { %2508 = vmatmul.mubr.msk.bf16.vlgmr.msra.gmra.mrb[16].mxu0 %vm746_vm1, %v1339_v41 }
 0x844   : > { %2521 = vmatprep.mubr.msk.bf16.mxu0 %vm3171_vm0, %v3170_v0  ;;  %2520 = vmatpush3.bf16.xpose.msra.mxu0 %v1456_v50 }
 0x845   : > { %2531 = vmatprep.subr.bf16.mxu0 %v3170_v0 }
 0x916   : > { %v1386_v52 = vpop.f32.mrb[16].mxu0 }
 0x917   : > { %v1387_v53 = vadd.f32 %v2361_v51, %v1386_v52  ;;  %v2509_v54 = vpop.f32.mrb[17].mxu0 }
 0x918   : > { %v1389_v55 = vpop.f32.mrb[18].mxu0 }
 0x919   : > { %v1450_v57 = vpack.c.bf16 %v1387_v53, %v1387_v53  ;;  %v2510_v58 = vpop.f32.mrb[19].mxu0 }
 0x91b   : > { %1563 = vrot.lane.b32.xlu1 %v1450_v57, %s4062_s10  ;;  %2522 = vmatmul.mubr.msk.bf16.vlgmr.msra.gmra.mrb[20].mxu0 %vm794_vm2, %v1450_v57  ;;  %s4069_s10 = sld [smem:[#allocation37_spill]] }
 0x91c   : > { %2532 = vmatpush3.bf16.xpose.msra.mxu0 %v1571_v59  ;;  %2533 = vmatprep.mubr.msk.bf16.mxu0 %vm3171_vm0, %v3170_v0 }
 0x91d   : > { %2543 = vmatprep.subr.bf16.mxu0 %v3170_v0 }
 0x91f   : > { %1674 = vrot.lane.b32.xlu1 %v1450_v57, %s4063_s14  ;;  %s4072_s14 = smov 24  }
 0x923   : > { %1785 = vrot.lane.b32.xlu1 %v1450_v57, %s4064_s25  ;;  %s4074_s25 = sshll.u32 %s3584_s8, 3 }
 0x98d   : > { %v1564_v61 = vpop.permute.xlu1 %1563 }
 0x98e   : > { %2534 = vmatmul.mubr.msk.bf16.vlgmr.msra.gmra.mrb[24].mxu0 %vm794_vm2, %v1564_v61 }
 0x98f   : > { %2544 = vmatpush3.bf16.xpose.msra.mxu0 %v1682_v62  ;;  %2545 = vmatprep.mubr.msk.bf16.mxu0 %vm3171_vm0, %v3170_v0 }
 0x990   : > { %2555 = vmatprep.subr.bf16.mxu0 %v3170_v0 }
 0x991   : > { %v1675_v1 = vpop.permute.xlu1 %1674 }
 0x995   : > { %v1786_v3 = vpop.permute.xlu1 %1785 }
 0x996   : > { %2546 = vmatmul.mubr.msk.bf16.vlgmr.msra.gmra.mrb[28].mxu0 %vm794_vm2, %v1675_v1 }
 0x997   : > { %2556 = vmatpush3.bf16.xpose.msra.mxu0 %v1793_v2  ;;  %2557 = vmatprep.mubr.msk.bf16.mxu0 %vm3171_vm0, %v3170_v0 }
 0x998   : > { %2567 = vmatprep.subr.bf16.mxu0 %v3170_v0 }
 0x99e   : > { %2558 = vmatmul.mubr.msk.bf16.vlgmr.msra.gmra.mrb[32].mxu0 %vm794_vm2, %v1786_v3 }
 0x99f   : > { %2571 = vmatprep.mubr.msk.bf16.mxu0 %vm3171_vm0, %v3170_v0 }
 0x9ee   : > { %v1492_v4 = vpop.f32.mrb[20].mxu0 }
 0x9ef   : > { %v1498_v5 = vmul.f32 0.35355338, %v1492_v4  ;;  %v2523_v6 = vpop.f32.mrb[21].mxu0 }
 0x9f0   : > { %v1495_v8 = vpop.f32.mrb[22].mxu0 }
 0x9f1   : > { %v2524_v9 = vpop.f32.mrb[23].mxu0  ;;  %v1500_v10 = vsel %vm1499_vm6, %v1498_v5, -inf }
 0x9f2   : > { %1501 = vmax.xlane.f32.xlu0 %v1500_v10 }
 0xa61   : > { %v1607_v11 = vpop.f32.mrb[24].mxu0 }
 0xa62   : > { %v1613_v12 = vmul.f32 0.35355338, %v1607_v11  ;;  %v2535_v13 = vpop.f32.mrb[25].mxu0 }
 0xa63   : > { %v1610_v15 = vpop.f32.mrb[26].mxu0 }
 0xa64   : > { %v2536_v7 = vpop.f32.mrb[27].mxu0  ;;  %v1614_v16 = vsel %vm1499_vm6, %v1613_v12, -inf }
 0xa65   : > { %1615 = vmax.xlane.f32.xlu1 %v1614_v16 }
 0xa69   : > { %v1718_v17 = vpop.f32.mrb[28].mxu0 }
 0xa6a   : > { %v1724_v18 = vmul.f32 0.35355338, %v1718_v17  ;;  %v2547_v19 = vpop.f32.mrb[29].mxu0 }
 0xa6b   : > { %v1721_v20 = vpop.f32.mrb[30].mxu0  ;;  %v1912_v19 = vld [vmem:[%s4069_s10 + $0x8] sm:$0xff] }
 0xa6c   : > { %v2548_v14 = vpop.f32.mrb[31].mxu0  ;;  %v1725_v21 = vsel %vm1499_vm6, %v1724_v18, -inf }
 0xa6d   : > { %1726 = vmax.xlane.f32.xlu0 %v1725_v21 }
 0xa71   : > { %v1829_v22 = vpop.f32.mrb[32].mxu0 }
 0xa72   : > { %v1835_v23 = vmul.f32 0.35355338, %v1829_v22  ;;  %v2559_v24 = vpop.f32.mrb[33].mxu0 }
 0xa73   : > { %v1832_v25 = vpop.f32.mrb[34].mxu0  ;;  %v1914_v24 = vld [vmem:[%s4069_s10 + $0x18] sm:$0xff] }
 0xa74   : > { %v2560_v26 = vpop.f32.mrb[35].mxu0  ;;  %v1836_v27 = vsel %vm1499_vm6, %v1835_v23, -inf }
 0xa75   : > { %1837 = vmax.xlane.f32.xlu0 %v1836_v27 }
 0xa7f   : > { %v1502_v28 = vpop.xlane.xlu0 %1501 }
 0xa80   : > { %v1503_v29 = vsub.f32 %v1498_v5, %v1502_v28 }
 0xa82   : > { %v1504_v30 = vmul.f32 1.442695, %v1503_v29 }
 0xa84   : > { %2768 = vpow2.f32 %v1504_v30 }
 0xa8e   : > { %v2769_v32 = vpop.eup %2768 }
 0xa8f   : > { %v1506_v35 = vsel %vm1499_vm6, %v2769_v32, 0.0 }
 0xa90   : > { %1507 = vadd.xlane.f32.xlu1 %v1506_v35 }
 0xaa1   : > { %1513 = vrot.lane.b32.xlu1 %v3791_v49, %s4065_s0  ;;  %s4070_s0 = smov 8  }
 0xaf2   : > { %v1616_v36 = vpop.xlane.xlu1 %1615 }
 0xaf3   : > { %v1617_v37 = vsub.f32 %v1613_v12, %v1616_v36 }
 0xaf5   : > { %v1618_v38 = vmul.f32 1.442695, %v1617_v37 }
 0xaf7   : > { %2770 = vpow2.f32 %v1618_v38 }
 0xafa   : > { %v1727_v39 = vpop.xlane.xlu0 %1726 }
 0xafb   : > { %v1728_v41 = vsub.f32 %v1724_v18, %v1727_v39  ;;  %v1911_v18 = vld [vmem:[%s4069_s10] sm:$0xff] }
 0xafc   : > { %v1916_v20 = vpack.c.bf16 %v1912_v19, %v1911_v18 }
 0xafd   : > { %v1729_v42 = vmul.f32 1.442695, %v1728_v41 }
 0xafe   : > { %2568 = vmatpush3.bf16.msra.mxu0 %v1916_v20 }
 0xaff   : > { %2772 = vpow2.f32 %v1729_v42  ;;  %2569 = vmatprep.subr.bf16.mxu0 %v3170_v0 }
 0xb01   : > { %v2771_v43 = vpop.eup %2770 }
 0xb02   : > { %v1838_v44 = vpop.xlane.xlu0 %1837  ;;  %v1620_v45 = vsel %vm1499_vm6, %v2771_v43, 0.0 }
 0xb03   : > { %v1839_v46 = vsub.f32 %v1835_v23, %v1838_v44  ;;  %1621 = vadd.xlane.f32.xlu0 %v1620_v45  ;;  %v1913_v23 = vld [vmem:[%s4069_s10 + $0x10] sm:$0xff] }
 0xb04   : > { %v1917_v26 = vpack.c.bf16 %v1914_v24, %v1913_v23  ;;  %v2375_v24 = vld [vmem:[#allocation13] ss:$0 sm:$0xff] }
 0xb05   : > { %v1840_v47 = vmul.f32 1.442695, %v1839_v46  ;;  %v2373_v46 = vld [vmem:[#allocation10] ss:$0 sm:$0xff] }
 0xb06   : > { %2570 = vmatpush3.bf16.msra.mxu0 %v1917_v26 }
 0xb07   : > { %2774 = vpow2.f32 %v1840_v47  ;;  %2583 = vmatprep.subr.bf16.mxu0 %v3170_v0 }
 0xb09   : > { %v2773_v48 = vpop.eup %2772 }
 0xb0a   : > { %v1731_v50 = vsel %vm1499_vm6, %v2773_v48, 0.0 }
 0xb0b   : > { %1732 = vadd.xlane.f32.xlu1 %v1731_v50 }
 0xb11   : > { %v2775_v51 = vpop.eup %2774 }
 0xb12   : > { %v1842_v52 = vsel %vm1499_vm6, %v2775_v51, 0.0 }
 0xb13   : > { %1843 = vadd.xlane.f32.xlu0 %v1842_v52 }
 0xb1c   : > { %1737 = vrot.lane.b32.xlu1 %v3791_v49, %s4066_s21  ;;  %s4073_s21 = sld [smem:[#allocation38_spill]] }
 0xb1d   : > { %v1508_v53 = vpop.xlane.xlu1 %1507 }
 0xb1e   : > { %2776 = vrcp.f32 %v1508_v53 }
 0xb20   : > { %1848 = vrot.lane.b32.xlu1 %v3791_v49, %s4067_s22 }
 0xb21   : > { %v1514_v54 = vpop.permute.xlu1 %1513 }
 0xb22   : > { %v1520_v55 = vsel %vm1518_vm7, %v1514_v54, 0  ;;  %v2054_v19 = vld [vmem:[%s4073_s21 + $0x20] sm:$0xff]  ;;  %v2055_v20 = vld [vmem:[%s4073_s21 + $0x28] sm:$0xff] }
 0xb23   : > { %2526 = vmatpush3.bf16.msra.mxu1 %v1520_v55 }
 0xb24   : > { %2537 = vmatprep.subr.bf16.mxu1 %v3170_v0 }
 0xb28   : > { %v2777_v56 = vpop.eup %2776 }
 0xb29   : > { %v1510_v57 = vmul.f32 %v2777_v56, %v2769_v32  ;;  %1626 = vrot.lane.b32.xlu0 %v3791_v49, %s4068_s6 }
 0xb2b   : > { %v1511_v58 = vpack.c.bf16 %v1510_v57, %v1510_v57 }
 0xb2d   : > { %2528 = vmatmul.mubr.msk.bf16.vlgmr.msra.gmra.mrb[28].mxu1 %vm1499_vm6, %v1511_v58 }
 0xb2e   : > { %2539 = vmatprep.mubr.msk.bf16.mxu1 %vm3171_vm0, %v3170_v0 }
 0xb90   : > { %v1622_v59 = vpop.xlane.xlu0 %1621 }
 0xb91   : > { %2778 = vrcp.f32 %v1622_v59 }
 0xb98   : > { %v1733_v60 = vpop.xlane.xlu1 %1732 }
 0xb99   : > { %2780 = vrcp.f32 %v1733_v60  ;;  %v1992_v60 = vld [vmem:[#allocation11] sm:$0xff] }
 0xb9b   : > { %v2779_v61 = vpop.eup %2778 }
 0xb9c   : > { %v1624_v63 = vmul.f32 %v2779_v61, %v2771_v43  ;;  %v1738_v3 = vpop.permute.xlu1 %1737  ;;  %v1993_v61 = vld [vmem:[#allocation11 + $0x8] sm:$0xff] }
 0xb9d   : > { %v1743_v5 = vsel %vm1518_vm7, %v1738_v3, 0  ;;  %v2051_v3 = vld [vmem:[%s4073_s21 + $0x8] sm:$0xff] }
 0xb9e   : > { %v1625_v49 = vpack.c.bf16 %v1624_v63, %v1624_v63  ;;  %v1994_v63 = vld [vmem:[#allocation11 + $0x10] sm:$0xff] }
 0xba0   : > { %v1844_v62 = vpop.xlane.xlu0 %1843  ;;  %v1849_v8 = vpop.permute.xlu1 %1848 }
 0xba1   : > { %2782 = vrcp.f32 %v1844_v62  ;;  %v1854_v11 = vsel %vm1518_vm7, %v1849_v8, 0  ;;  %v1997_v62 = vpack.c.bf16 %v1993_v61, %v1992_v60 }
 0xba3   : > { %v2781_v4 = vpop.eup %2780 }
 0xba4   : > { %v1627_v1 = vpop.permute.xlu0 %1626  ;;  %v1735_v6 = vmul.f32 %v2781_v4, %v2773_v48 }
 0xba5   : > { %v1632_v2 = vsel %vm1518_vm7, %v1627_v1, 0  ;;  %v1995_v1 = vld [vmem:[#allocation11 + $0x18] sm:$0xff] }
 0xba6   : > { %2538 = vmatpush3.bf16.msra.mxu1 %v1632_v2  ;;  %v1736_v9 = vpack.c.bf16 %v1735_v6, %v1735_v6  ;;  %v1998_v2 = vpack.c.bf16 %v1995_v1, %v1994_v63 }
 0xba7   : > { %2549 = vmatprep.subr.bf16.mxu1 %v3170_v0 }
 0xba9   : > { %2540 = vmatmul.mubr.msk.bf16.vlgmr.msra.gmra.mrb[32].mxu1 %vm1499_vm6, %v1625_v49  ;;  %v2052_v49 = vld [vmem:[%s4073_s21 + $0x10] sm:$0xff] }
 0xbaa   : > { %2550 = vmatpush3.bf16.msra.mxu1 %v1743_v5  ;;  %2551 = vmatprep.mubr.msk.bf16.mxu1 %vm3171_vm0, %v3170_v0  ;;  %v2053_v5 = vld [vmem:[%s4073_s21 + $0x18] sm:$0xff] }
 0xbab   : > { %2561 = vmatprep.subr.bf16.mxu1 %v3170_v0  ;;  %v2783_v10 = vpop.eup %2782  ;;  %v2060_v6 = vpack.c.bf16 %v2053_v5, %v2052_v49 }
 0xbac   : > { %v1846_v12 = vmul.f32 %v2783_v10, %v2775_v51 }
 0xbae   : > { %v1847_v13 = vpack.c.bf16 %v1846_v12, %v1846_v12 }
 0xbb1   : > { %2552 = vmatmul.mubr.msk.bf16.vlgmr.msra.gmra.mrb[36].mxu1 %vm1499_vm6, %v1736_v9 }
 0xbb2   : > { %2562 = vmatpush3.bf16.msra.mxu1 %v1854_v11  ;;  %2563 = vmatprep.mubr.msk.bf16.mxu1 %vm3171_vm0, %v3170_v0  ;;  %v1984_v11 = vsub.s32 1, %v3775_v31 }
 0xbb3   : > { %2575 = vmatprep.subr.bf16.mxu1 %v3170_v0 }
 0xbb4   : > { %v1985_v12 = vrot.slane %v3778_v33, %v1984_v11 }
 0xbb9   : > { %2564 = vmatmul.mubr.msk.bf16.vlgmr.msra.gmra.mrb[40].mxu1 %vm1499_vm6, %v1847_v13 }
 0xbba   : > { %2579 = vmatprep.mubr.msk.bf16.mxu1 %vm3171_vm0, %v3170_v0  ;;  %2576 = vmatpush3.bf16.msra.mxu1 %v1997_v62 }
 0xbbb   : > { %2577 = vmatprep.subr.bf16.mxu1 %v3170_v0 }
 0xbbe   : > { %2578 = vmatpush3.bf16.msra.mxu1 %v1998_v2 }
 0xc00   : > { %v1556_v15 = vpop.f32.mrb[28].mxu1 }
 0xc01   : > { %v2529_v7 = vpop.f32.mrb[29].mxu1 }
 0xc02   : > { %v1559_v16 = vpop.f32.mrb[30].mxu1  ;;  %v1990_v7 = vrot.slane %v3780_v34, %v1984_v11 }
 0xc03   : > { %v2530_v17 = vpop.f32.mrb[31].mxu1 }
 0xc7c   : > { %v1668_v14 = vpop.f32.mrb[32].mxu1 }
 0xc7d   : > { %1897 = vrot.lane.b32.xlu0 %v1668_v14, %s4070_s0  ;;  %v2541_v21 = vpop.f32.mrb[33].mxu1  ;;  %v2061_v14 = vpack.c.bf16 %v2055_v20, %v2054_v19  ;;  %s720_s0 = scalar_lea.vmem [#allocation19], %s4074_s25  ;;  %s3074_s25 = sshll.u32 %s3186_s1, 4  ;;  %s3075_s25 = int_to_ptr.vmem [resolvable:$false] %s3074_s25 }
 0xc7e   : > { %v1671_v22 = vpop.f32.mrb[34].mxu1  ;;  %v2056_v21 = vld [vmem:[%s4073_s21 + $0x30] sm:$0xff]  ;;  %s2153_s22 = sshll.u32 %s720_s0, 4  ;;  %s3076_s10 = scalar_lea.vmem %s3075_s25, 256  ;;  %s3930_s22 = int_to_ptr.vmem [resolvable:$true] %s2153_s22 }
 0xc7f   : > { %v2542_v25 = vpop.f32.mrb[35].mxu1  ;;  %v2057_v22 = vld [vmem:[%s4073_s21 + $0x38] sm:$0xff]  ;;  %s3070_s7 = scalar_lea.vmem %s3930_s22, 128  ;;  %p3077_p11 = scmp.lt.s32.totalorder %s3930_s22, %s3075_s25 }
 0xc80   : > { %v2062_v23 = vpack.c.bf16 %v2057_v22, %v2056_v21  ;;  %p3071_p3 = scmp.ne.s32.totalorder %s3930_s22, %s3070_s7  ;;  %p3078_p12 = scmp.lt.s32.totalorder %s3076_s10, %s3070_s7 }
 0xc82   : > { %p3072_p0 = pnand %p3071_p3, %p4076_p2  ;;  %p3079_p8 = por %p3078_p12, %p3077_p11 }
 0xc84   : > { %v1779_v27 = vpop.f32.mrb[36].mxu1  ;;  %p3073_p6 = pneg %p3072_p0 }
 0xc85   : > { %1901 = vrot.lane.b32.xlu1 %v1779_v27, %s4071_s2  ;;  %v2553_v28 = vpop.f32.mrb[37].mxu1  ;;  %s4075_s2 = sld [smem:[#allocation39_spill]] }
 0xc86   : > { %v1782_v29 = vpop.f32.mrb[38].mxu1  ;;  %p3080_p5 = pnand %p3079_p8, %p3073_p6 }
 0xc87   : > { %v2554_v30 = vpop.f32.mrb[39].mxu1 }
 0xc8c   : > { %v1890_v32 = vpop.f32.mrb[40].mxu1 }
 0xc8d   : > { %1905 = vrot.lane.b32.xlu0 %v1890_v32, %s4072_s14  ;;  %v2565_v35 = vpop.f32.mrb[41].mxu1  ;;  %s3928_s14 = scalar_lea.hbm %s4075_s2, %s2380_s4 }
 0xc8e   : > { %v1893_v36 = vpop.f32.mrb[42].mxu1 }
 0xc8f   : > { %v2566_v37 = vpop.f32.mrb[43].mxu1 }
 0xcef   : > { %v1898_v38 = vpop.permute.xlu0 %1897 }
 0xcf0   : > { %v1908_v41 = vsel %vm794_vm2, %v1556_v15, %v1898_v38 }
 0xcf7   : > { %v1902_v39 = vpop.permute.xlu1 %1901 }
 0xcf8   : > { %v1909_v42 = vsel %vm1249_vm4, %v1908_v41, %v1902_v39 }
 0xcff   : > { %v1906_v43 = vpop.permute.xlu0 %1905 }
 0xd00   : > { %v1910_v44 = vsel %vm1251_vm5, %v1909_v42, %v1906_v43 }
 0xd01   : > { %v1915_v45 = vpack.c.bf16 %v1910_v44, %v1910_v44 }
 0xd03   : > { %2572 = vmatmul.mubr.msk.bf16.vlgmr.msra.gmra.mrb[36].mxu0 %vm746_vm1, %v1915_v45 }
 0xd04   : > { %2591 = vmatprep.mubr.msk.bf16.mxu0 %vm3171_vm0, %v3170_v0 }
 0xdd6   : > { %v1962_v47 = vpop.f32.mrb[36].mxu0 }
 0xdd7   : > { %v1963_v48 = vadd.f32 %v2373_v46, %v1962_v47  ;;  %v2573_v50 = vpop.f32.mrb[37].mxu0 }
 0xdd8   : > { %v1965_v51 = vpop.f32.mrb[38].mxu0 }
 0xdd9   : > { %v2574_v52 = vpop.f32.mrb[39].mxu0  ;;  %v1968_v53 = vadd.f32 %v1963_v48, %v3784_v40  ;;  %v2050_v40 = vld [vmem:[%s4073_s21] sm:$0xff] }
 0xdda   : > { %v2059_v4 = vpack.c.bf16 %v2051_v3, %v2050_v40  ;;  %v2130_v52 = vsub.s32 2, %v3775_v31 }
 0xddb   : > { %v1969_v54 = vsel %vm746_vm1, %v1968_v53, 0.0 }
 0xddc   : > { %1970 = vadd.xlane.f32.xlu1 %v1969_v54  ;;  %2584 = vmatpush3.bf16.msra.mxu0 %v2059_v4 }
 0xddd   : > { %2585 = vmatprep.subr.bf16.mxu0 %v3170_v0 }
 0xde0   : > { %2586 = vmatpush3.bf16.msra.mxu0 %v2060_v6 }
 0xde1   : > { %2587 = vmatprep.subr.bf16.mxu0 %v3170_v0 }
 0xde4   : > { %2588 = vmatpush3.bf16.msra.mxu0 %v2061_v14 }
 0xde5   : > { %2589 = vmatprep.subr.bf16.mxu0 %v3170_v0  ;;  %v2377_v0 = vld [vmem:[#allocation14] ss:$0 sm:$0xff] }
 0xde8   : > { %2590 = vmatpush3.bf16.msra.mxu0 %v2062_v23 }
 0xe69   : > { %v1971_v55 = vpop.xlane.xlu1 %1970 }
 0xe6a   : > { %v1972_v56 = vmul.f32 0.03125, %v1971_v55 }
 0xe6c   : > { %v1973_v57 = vsub.f32 %v1968_v53, %v1972_v56  ;;  %v2131_v53 = vrot.slane %v3778_v33, %v2130_v52  ;;  %v2136_v56 = vrot.slane %v3780_v34, %v2130_v52 }
 0xe6e   : > { %v1974_v58 = vmul.f32 %v1973_v57, %v1973_v57 }
 0xe70   : > { %v1975_v59 = vsel %vm746_vm1, %v1974_v58, 0.0 }
 0xe71   : > { %1976 = vadd.xlane.f32.xlu0 %v1975_v59 }
 0xefe   : > { %v1977_v8 = vpop.xlane.xlu0 %1976 }
 0xeff   : > { %v1978_v9 = vmul.f32 0.03125, %v1977_v8 }
 0xf01   : > { %v1979_v10 = vadd.f32 1e-05, %v1978_v9 }
 0xf03   : > { %2784 = vrsqrt.f32 %v1979_v10 }
 0xf0d   : > { %v2785_v13 = vpop.eup %2784 }
 0xf0e   : > { %v1981_v15 = vmul.f32 %v2785_v13, %v1973_v57 }
 0xf10   : > { %v1986_v16 = vmul.f32 %v1985_v12, %v1981_v15 }
 0xf12   : > { %v1991_v17 = vadd.f32 %v1990_v7, %v1986_v16 }
 0xf14   : > { %v1996_v18 = vpack.c.bf16 %v1991_v17, %v1991_v17 }
 0xf16   : > { %2580 = vmatmul.mubr.msk.bf16.vlgmr.msra.gmra.mrb[44].mxu1 %vm746_vm1, %v1996_v18 }
 0xfe9   : > { %v2043_v25 = vpop.f32.mrb[44].mxu1 }
 0xfea   : > { %v2044_v26 = vadd.f32 %v2375_v24, %v2043_v25  ;;  %v2581_v27 = vpop.f32.mrb[45].mxu1 }
 0xfeb   : > { %v2046_v28 = vpop.f32.mrb[46].mxu1 }
 0xfec   : > { %v2049_v29 = vmax.f32 %v2044_v26, 0.0  ;;  %v2582_v30 = vpop.f32.mrb[47].mxu1 }
 0xfee   : > { %v2058_v32 = vpack.c.bf16 %v2049_v29, %v2049_v29 }
 0xff0   : > { %2592 = vmatmul.mubr.msk.bf16.vlgmr.msra.gmra.mrb[40].mxu0 %vm2070_vm8, %v2058_v32 }
0x10c3   : > { %v2108_v35 = vpop.f32.mrb[40].mxu0 }
0x10c4   : > { %v2109_v36 = vadd.f32 %v2377_v0, %v2108_v35  ;;  %v2593_v37 = vpop.f32.mrb[41].mxu0 }
0x10c5   : > { %v2111_v38 = vpop.f32.mrb[42].mxu0 }
0x10c6   : > { %v2594_v39 = vpop.f32.mrb[43].mxu0  ;;  %v2114_v41 = vadd.f32 %v2109_v36, %v1991_v17 }
0x10c8   : > { %v2115_v42 = vsel %vm746_vm1, %v2114_v41, 0.0 }
0x10c9   : > { %2116 = vadd.xlane.f32.xlu0 %v2115_v42 }
0x1156   : > { %v2117_v43 = vpop.xlane.xlu0 %2116 }
0x1157   : > { %v2118_v44 = vmul.f32 0.03125, %v2117_v43 }
0x1159   : > { %v2119_v45 = vsub.f32 %v2114_v41, %v2118_v44 }
0x115b   : > { %v2120_v46 = vmul.f32 %v2119_v45, %v2119_v45 }
0x115d   : > { %v2121_v47 = vsel %vm746_vm1, %v2120_v46, 0.0 }
0x115e   : > { %2122 = vadd.xlane.f32.xlu1 %v2121_v47 }
0x11eb   : > { %v2123_v48 = vpop.xlane.xlu1 %2122 }
0x11ec   : > { %v2124_v50 = vmul.f32 0.03125, %v2123_v48 }
0x11ee   : > { %v2125_v51 = vadd.f32 1e-05, %v2124_v50 }
0x11f0   : > { %2786 = vrsqrt.f32 %v2125_v51 }
0x11fa   : > { %v2787_v54 = vpop.eup %2786 }
0x11fb   : > { %v2127_v55 = vmul.f32 %v2787_v54, %v2119_v45 }
0x11fd   : > { %v2132_v57 = vmul.f32 %v2131_v53, %v2127_v55 }
0x11ff   : > { %v2137_v58 = vadd.f32 %v2136_v56, %v2132_v57 }
0x1201   : > { %2138 = vst.msk [vmem:[%s720_s0] sm:$0xff] %vm746_vm1, %v2137_v58 }
0x1202   : > { %3083 = shalt.err (!%p3080_p5)
}
0x1203   : > { %s3084_s8 = scalar_lea.hbm %s3928_s14, 128  ;;  %s3088_s6 = scalar_lea.hbm %s4075_s2, 256 }
0x1204   : > { %p3085_p9 = scmp.ne.s32.totalorder %s3928_s14, %s3084_s8  ;;  %p3089_p4 = scmp.lt.u32.totalorder %s3928_s14, %s4075_s2 }
0x1205   : > { %p3090_p13 = scmp.lt.u32.totalorder %s3088_s6, %s3084_s8  ;;  %p3092_p3 = scmp.lt.u32.totalorder %s3084_s8, %s3928_s14 }
0x1206   : > { %p3086_p7 = pnand %p3085_p9, %p4076_p2 }
0x1207   : > { %p3091_p1 = por %p3090_p13, %p3089_p4 }
0x1208   : > { %p3087_p10 = pneg %p3086_p7 }
0x1209   : > { %p3093_p0 = por %p3092_p3, %p3091_p1 }
0x120b   : > { %p3094_p6 = pnand %p3093_p0, %p3087_p10 }
0x120d   : > { %3097 = shalt.err (!%p3094_p6)
}
0x120e   : > { %2633 = dma.vmem_to_hbm [thread:$0]  (%p4076_p2), %s3930_s22, 128, %s3928_s14, %s2140_s5  }
0x120f PF: > { %s2165_s7 = sand.u32 1, %s3144_s27   ;;  %p4077_p11 = scmp.ne.s32.totalorder %s4042_s26, 0 }
0x1210   : > { %p4078_p12 = scmp.ge.s32.totalorder %s3156_s30, 2  ;;  %s2166_s10 = scalar_lea.sflag [#allocation4], %s2165_s7 }
0x1212   : > { %p2668_p8 = pnand %p4078_p12, %p4077_p11 }
0x1214   : > { %3139 = dma.done.wait (!%p2668_p8), %s2166_s10, 128  }
0x1215   : > { %3141 = vsyncadd (!%p2668_p8), %s2166_s10, 4294967168  ;;  %p36_p5 = scmp.ge.s32.totalorder %s3514_s24, 4   ;;  %s4079_s27 = smov %s3148_s28 }
0x1216   : > { %s4080_s28 = smov %s3152_s29  ;;  %s4081_s29 = smov %s3526_s9 }
0x1217   : > { %s4082_s30 = smov %s3514_s24  ;;  %38 = sbr.rel (!%p36_p5) target bundleno = 24 (0x18), region = 176 }
0x121e   :  { %2171 = vsyncpa [#allocation3], 1 }
0x121f   :  { %2173 = vsyncpa [#allocation3 + $0x1], 1 }
0x1220   :  { %2174 = vsyncpa [#allocation6], 1 }
0x1221   :  { %2175 = vsyncpa [#allocation9], 1 }
0x1222   :  { %2176 = vsyncpa [#allocation12], 1 }
0x1223   :  { %2177 = vsyncpa [#allocation15], 1 }
0x1224   :  { %2178 = vsyncpa [#allocation18], 1 }
0x1225   :  { %2179 = vsyncpa [#allocation4], 1 }
0x1226   :  { %2181 = vsyncpa [#allocation4 + $0x1], 1 }

</bundles_post_ra>
